<compile_context>
chip_gen: v5e
topology: v5e:2x2
jax: 0.10.0
libtpu: 0.0.40
codegen_flags: <defaults>
</compile_context>

<pallas_src>
import functools
import math

import jax
import jax.numpy as jnp
from jax.experimental import pallas as pl
from jax.experimental.pallas import tpu as pltpu


_INV_SQRT2 = 1.0 / math.sqrt(2.0)


def _gelu(y):
    # Exact erf-based GELU (matches the original BERT `gelu`).  A tanh-approx
    # (EUP) variant would be cheaper when VALU-bound, but we keep the module's
    # exact semantics.
    return y * 0.5 * (1.0 + jax.lax.erf(y * jnp.float32(_INV_SQRT2)))


def _round_up(x, m):
    return ((x + m - 1) // m) * m


def _tpu_generation():
    try:
        kind = jax.devices()[0].device_kind.lower()
    except Exception:
        return 6
    for g in (7, 6, 5, 4, 3, 2):
        if str(g) in kind:
            return g
    return 6


def _vmem_capacity_bytes(gen):
    try:
        return int(pltpu.get_tpu_info().vmem_capacity_bytes)
    except Exception:
        return (64 << 20) if gen >= 7 else (128 << 20)


# ----------------------------------------------------------------------------
# Kernels
# ----------------------------------------------------------------------------
def _dense_gelu_ln_kernel(x_ref, w_ref, b_ref, g_ref, be_ref, o_ref, *, eps):
    """Plain path: hidden size is already lane-dense (or not packable)."""
    xb = x_ref[...].astype(jnp.bfloat16)                   # bf16 MXU operand
    y = jnp.dot(xb, w_ref[...], preferred_element_type=jnp.float32)
    y = y + b_ref[...]
    y = _gelu(y)
    mean = jnp.mean(y, axis=-1, keepdims=True)
    c = y - mean
    var = jnp.mean(c * c, axis=-1, keepdims=True)
    inv = jax.lax.rsqrt(var + jnp.float32(eps))
    o_ref[...] = (c * inv * g_ref[...] + be_ref[...]).astype(o_ref.dtype)


def _dense_gelu_ln_packed_kernel(x_ref, w_ref, b_ref, g_ref, be_ref, a_ref,
                                 o_ref, *, eps):
    """Lane-packed path: `pack` tokens per (128|256)-lane row.

    w_ref = kron(I_pack, W) (block-diagonal dense weight, bf16) and
    a_ref = kron(I_pack, ones(H,H)/H) (segment-averaging matrix, bf16), so the
    per-token LayerNorm statistics come out already broadcast across each
    token's H-lane segment: every VPU/EUP op and the store are lane-dense.
    E[y] and E[y^2] are two *independent* matmuls (no mean->var MXU chain);
    var = E[y^2] - mean^2 (mild cancellation, fine in f32 for post-GELU y).
    """
    xb = x_ref[...].astype(jnp.bfloat16)
    y = jnp.dot(xb, w_ref[...], preferred_element_type=jnp.float32)
    y = y + b_ref[...]
    y = _gelu(y)
    a = a_ref[...]
    yb = y.astype(jnp.bfloat16)
    y2b = (y * y).astype(jnp.bfloat16)
    mean = jnp.dot(yb, a, preferred_element_type=jnp.float32)
    ey2 = jnp.dot(y2b, a, preferred_element_type=jnp.float32)
    var = jnp.maximum(ey2 - mean * mean, 0.0)
    inv = jax.lax.rsqrt(var + jnp.float32(eps))
    o_ref[...] = ((y - mean) * inv * g_ref[...] + be_ref[...]).astype(o_ref.dtype)


# ----------------------------------------------------------------------------
# Parameter preparation (ONCE, at model init — not per forward call)
# ----------------------------------------------------------------------------
def prepare_decoder_params(w, b, gamma, beta):
    """`w` is the (H, H) matrix applied as y = x @ w (nn.Linear weight,
    pre-transposed).  b/gamma/beta are (H,)."""
    H = int(w.shape[0])
    gen = _tpu_generation()
    lane_target = 256 if gen >= 6 else 128   # MXU width: 128 on <=v5, 256 on v6e/v7x
    pack = lane_target // H if (H < lane_target and lane_target % H == 0) else 1
    hp = H * pack

    f32 = jnp.float32
    if pack > 1:
        w_eff = jnp.kron(jnp.eye(pack, dtype=f32), w.astype(f32)).astype(jnp.bfloat16)
        a_mat = jnp.kron(jnp.eye(pack, dtype=f32),
                         jnp.full((H, H), 1.0 / H, dtype=f32)).astype(jnp.bfloat16)
        b_eff = jnp.tile(b.astype(f32), pack).reshape(1, hp)
        g_eff = jnp.tile(gamma.astype(f32), pack).reshape(1, hp)
        be_eff = jnp.tile(beta.astype(f32), pack).reshape(1, hp)
    else:
        # TODO(synk): for very large H the resident (H, H) weight should be
        # K/N-tiled with an accumulator instead of kept whole in VMEM.
        w_eff = w.astype(jnp.bfloat16)
        a_mat = None
        b_eff = b.astype(f32).reshape(1, hp)
        g_eff = gamma.astype(f32).reshape(1, hp)
        be_eff = beta.astype(f32).reshape(1, hp)

    return dict(H=H, pack=pack, hp=hp, gen=gen, w_eff=w_eff, a_mat=a_mat,
                b_eff=b_eff, g_eff=g_eff, be_eff=be_eff)


# ----------------------------------------------------------------------------
# Forward pass
# ----------------------------------------------------------------------------
def decoder_model_apply(hidden_states, params, *, eps=1e-12, max_tile_rows=1024):
    H, pack, hp, gen = params["H"], params["pack"], params["hp"], params["gen"]
    orig_shape = hidden_states.shape
    x2d = hidden_states.reshape(-1, H)
    n_tok = x2d.shape[0]

    # Minimal padding only: (a) to a multiple of the lane-packing factor so the
    # (n_tok, H) -> (rows, hp) reshape is a pure view, (b) up to 8 rows for the
    # degenerate tiny-input case.  NO padding to a full row-tile multiple —
    # the ragged last tile is handled by Pallas boundary masking.
    pad_tok = (pack - n_tok % pack) % pack
    rows = (n_tok + pad_tok) // pack
    if rows < 8:
        pad_tok += (8 - rows) * pack
        rows = 8
    if pad_tok:
        x2d = jnp.pad(x2d, ((0, pad_tok), (0, 0)))
    xp = x2d.reshape(rows, hp)

    x_item = jnp.dtype(xp.dtype).itemsize
    out_dtype = hidden_states.dtype
    out_item = jnp.dtype(out_dtype).itemsize
    w_bytes = hp * hp * 2                      # bf16 resident weight
    a_bytes = hp * hp * 2 if pack > 1 else 0   # bf16 averaging matrix

    # ---- generation-aware VMEM budget and row-tile selection -----------------
    vmem_cap = _vmem_capacity_bytes(gen)
    budget = min(int(0.55 * vmem_cap), 72 << 20)
    fixed = 2 * (w_bytes + a_bytes) + 8 * hp * 4            # conservative (2x consts)
    per_row = hp * (2 * x_item + 2 * out_item + 7 * 4)      # 2x-buffered tiles + f32 temps
    avail = max(budget - fixed, per_row * 8)
    tile_cap = max(8, min(max_tile_rows, (avail // per_row) // 8 * 8))
    tile_rows = min(tile_cap, _round_up(rows, 8))
    if rows > 8 and pl.cdiv(rows, tile_rows) < 2:
        # >=2 grid steps so both v7x TensorCores (and the pipeline) get work.
        tile_rows = max(8, _round_up(pl.cdiv(rows, 2), 8))
    grid_m = pl.cdiv(rows, tile_rows)

    est = fixed + tile_rows * per_row
    vmem_limit = int(min(max(est + (4 << 20), 32 << 20), int(0.9 * vmem_cap)))

    n_stat_mm = 2 if pack > 1 else 0
    cost = pl.CostEstimate(
        flops=int(2 * rows * hp * hp * (1 + n_stat_mm)),
        transcendentals=int(rows * hp),
        bytes_accessed=int(rows * hp * (x_item + out_item) + w_bytes + a_bytes),
    )

    def run(single_buffer_consts):
        def const_spec(shape):
            if single_buffer_consts:
                return pl.BlockSpec(shape, lambda i: (0, 0),
                                    pipeline_mode=pl.Buffered(1))
            return pl.BlockSpec(shape, lambda i: (0, 0))

        in_specs = [
            pl.BlockSpec((tile_rows, hp), lambda i: (i, 0)),   # x tile (streamed)
            const_spec((hp, hp)),                              # dense weight (resident)
            const_spec((1, hp)),                               # dense bias
            const_spec((1, hp)),                               # LN gamma
            const_spec((1, hp)),                               # LN beta
        ]
        if pack > 1:
            kernel = functools.partial(_dense_gelu_ln_packed_kernel, eps=eps)
            in_specs.append(const_spec((hp, hp)))              # segment-averaging matrix
            operands = (xp, params["w_eff"], params["b_eff"], params["g_eff"],
                        params["be_eff"], params["a_mat"])
        else:
            kernel = functools.partial(_dense_gelu_ln_kernel, eps=eps)
            operands = (xp, params["w_eff"], params["b_eff"], params["g_eff"],
                        params["be_eff"])

        return pl.pallas_call(
            kernel,
            out_shape=jax.ShapeDtypeStruct((rows, hp), out_dtype),
            grid_spec=pltpu.PrefetchScalarGridSpec(
                num_scalar_prefetch=0,
                grid=(grid_m,),
                in_specs=in_specs,
                out_specs=pl.BlockSpec((tile_rows, hp), lambda i: (i, 0)),
            ),
            compiler_params=pltpu.CompilerParams(
                dimension_semantics=("parallel",),
                vmem_limit_bytes=vmem_limit,
            ),
            cost_estimate=cost,
        )(*operands)

    try:
        out = run(True)
    except Exception:
        # pl.Buffered(1) / pipeline_mode unsupported on this jax build: fall
        # back to default double-buffered resident operands (a bit more VMEM).
        out = run(False)

    out = out.reshape(rows * pack, H)
    if rows * pack != n_tok:
        out = out[:n_tok]
    return out.reshape(orig_shape)


def decoder_model(hidden_states, w, b, gamma, beta, *, eps=1e-12):
    """Convenience wrapper; prefer prepare_decoder_params() once + apply()."""
    return decoder_model_apply(hidden_states,
                               prepare_decoder_params(w, b, gamma, beta), eps=eps)


# ----------------------------------------------------------------------------
# Reference & test
# ----------------------------------------------------------------------------
def reference(hidden_states, w, b, gamma, beta, eps=1e-12):
    y = hidden_states @ w + b
    y = y * 0.5 * (1.0 + jax.lax.erf(y * jnp.float32(_INV_SQRT2)))
    mean = jnp.mean(y, axis=-1, keepdims=True)
    var = jnp.mean((y - mean) ** 2, axis=-1, keepdims=True)
    return (y - mean) * jax.lax.rsqrt(var + eps) * gamma + beta


def _make_params(key, H):
    k_w, k_b, k_g, k_be = jax.random.split(key, 4)
    # nn.Linear(H, H) weight is applied as x @ W.T; store it pre-transposed.
    w = jax.random.normal(k_w, (H, H), dtype=jnp.float32) * 0.05
    b = jax.random.normal(k_b, (H,), dtype=jnp.float32) * 0.01
    gamma = 1.0 + 0.1 * jax.random.normal(k_g, (H,), dtype=jnp.float32)
    beta = 0.1 * jax.random.normal(k_be, (H,), dtype=jnp.float32)
    return w, b, gamma, beta


if __name__ == "__main__":
    key = jax.random.PRNGKey(0)
    k1, k2, k3, k4 = jax.random.split(key, 4)
    eps = 1e-12
    # bf16 MXU operands vs an all-f32 reference -> relaxed tolerance.
    atol = rtol = 5e-2
    ok = True

    # Case 1: toy config (hidden_size=32) -> lane-packed path.
    B, S, H = 2, 8, 32
    x = jax.random.normal(k1, (B, S, H), dtype=jnp.float32)
    w, b, gamma, beta = _make_params(k2, H)
    params = prepare_decoder_params(w, b, gamma, beta)        # once, at "init"
    out = jax.block_until_ready(decoder_model_apply(x, params, eps=eps))
    ref = reference(x, w, b, gamma, beta, eps=eps)
    ok &= out.shape == (B, S, H)
    ok &= bool(jnp.allclose(out, ref, atol=atol, rtol=rtol))

    # Case 2: H=128 with a token count that doesn't divide the row tile
    # (exercises boundary-block masking; packed path on v6e/v7x, plain on v5e).
    B2, S2, H2 = 2, 13, 128
    x2 = jax.random.normal(k3, (B2, S2, H2), dtype=jnp.float32)
    w2, b2, gamma2, beta2 = _make_params(k4, H2)
    params2 = prepare_decoder_params(w2, b2, gamma2, beta2)
    out2 = jax.block_until_ready(decoder_model_apply(x2, params2, eps=eps))
    ref2 = reference(x2, w2, b2, gamma2, beta2, eps=eps)
    ok &= out2.shape == (B2, S2, H2)
    ok &= bool(jnp.allclose(out2, ref2, atol=atol, rtol=rtol))

    assert ok, "mismatch vs reference"
    print("KERNEL_OK")
</pallas_src>

<mosaic_0001>
module attributes {stable_mosaic.version = 11 : i64} {
  func.func @_dense_gelu_ln_packed_kernel(%arg0: i32, %arg1: memref<8x256xf32, #tpu.memory_space<vmem>>, %arg2: memref<256x256xbf16, #tpu.memory_space<vmem>>, %arg3: memref<1x256xf32, #tpu.memory_space<vmem>>, %arg4: memref<1x256xf32, #tpu.memory_space<vmem>>, %arg5: memref<1x256xf32, #tpu.memory_space<vmem>>, %arg6: memref<256x256xbf16, #tpu.memory_space<vmem>>, %arg7: memref<8x256xf32, #tpu.memory_space<vmem>>) attributes {dimension_semantics = [#tpu.dimension_semantics<parallel>], iteration_bounds = array<i64: 1>, scalar_prefetch = 0 : i64, scratch_operands = 0 : i64, tpu.core_type = #tpu.core_type<tc>, window_params = [{transform_indices = @transform_0, window_bounds = array<i64: 8, 256>}, {pipeline_mode = #tpu.pipeline_mode<synchronous>, transform_indices = @transform_1, window_bounds = array<i64: 256, 256>}, {pipeline_mode = #tpu.pipeline_mode<synchronous>, transform_indices = @transform_2, window_bounds = array<i64: 1, 256>}, {pipeline_mode = #tpu.pipeline_mode<synchronous>, transform_indices = @transform_3, window_bounds = array<i64: 1, 256>}, {pipeline_mode = #tpu.pipeline_mode<synchronous>, transform_indices = @transform_4, window_bounds = array<i64: 1, 256>}, {pipeline_mode = #tpu.pipeline_mode<synchronous>, transform_indices = @transform_5, window_bounds = array<i64: 256, 256>}, {transform_indices = @transform_6, window_bounds = array<i64: 8, 256>}]} {
    %c0 = arith.constant 0 : index
    %c0_0 = arith.constant 0 : index
    %0 = vector.load %arg1[%c0, %c0_0] : memref<8x256xf32, #tpu.memory_space<vmem>>, vector<8x256xf32>
    %1 = arith.truncf %0 : vector<8x256xf32> to vector<8x256xbf16>
    %c0_1 = arith.constant 0 : index
    %c0_2 = arith.constant 0 : index
    %2 = vector.load %arg2[%c0_1, %c0_2] : memref<256x256xbf16, #tpu.memory_space<vmem>>, vector<256x256xbf16>
    %cst = arith.constant dense<0.000000e+00> : vector<8x256xf32>
    %3 = tpu.matmul %1, %2, %cst {dimension_numbers = #tpu.dot_dimension_numbers<[1], [0], [0], [1], [0, 0, 1, 1], [], []>} : vector<8x256xbf16>, vector<256x256xbf16>, vector<8x256xf32> -> vector<8x256xf32>
    %c0_3 = arith.constant 0 : index
    %c0_4 = arith.constant 0 : index
    %4 = vector.load %arg3[%c0_3, %c0_4] : memref<1x256xf32, #tpu.memory_space<vmem>>, vector<1x256xf32>
    %5 = vector.broadcast %4 : vector<1x256xf32> to vector<8x256xf32>
    %6 = arith.addf %3, %5 : vector<8x256xf32>
    %cst_5 = arith.constant 5.000000e-01 : f32
    %7 = vector.broadcast %cst_5 : f32 to vector<8x256xf32>
    %8 = arith.mulf %6, %7 : vector<8x256xf32>
    %cst_6 = arith.constant 0.707106769 : f32
    %9 = vector.broadcast %cst_6 : f32 to vector<8x256xf32>
    %10 = arith.mulf %6, %9 : vector<8x256xf32>
    %11 = math.erf %10 : vector<8x256xf32>
    %cst_7 = arith.constant 1.000000e+00 : f32
    %12 = vector.broadcast %cst_7 : f32 to vector<8x256xf32>
    %13 = arith.addf %12, %11 : vector<8x256xf32>
    %14 = arith.mulf %8, %13 : vector<8x256xf32>
    %c0_8 = arith.constant 0 : index
    %c0_9 = arith.constant 0 : index
    %15 = vector.load %arg6[%c0_8, %c0_9] : memref<256x256xbf16, #tpu.memory_space<vmem>>, vector<256x256xbf16>
    %16 = arith.truncf %14 : vector<8x256xf32> to vector<8x256xbf16>
    %17 = arith.mulf %14, %14 : vector<8x256xf32>
    %18 = arith.truncf %17 : vector<8x256xf32> to vector<8x256xbf16>
    %cst_10 = arith.constant dense<0.000000e+00> : vector<8x256xf32>
    %19 = tpu.matmul %16, %15, %cst_10 {dimension_numbers = #tpu.dot_dimension_numbers<[1], [0], [0], [1], [0, 0, 1, 1], [], []>} : vector<8x256xbf16>, vector<256x256xbf16>, vector<8x256xf32> -> vector<8x256xf32>
    %cst_11 = arith.constant dense<0.000000e+00> : vector<8x256xf32>
    %20 = tpu.matmul %18, %15, %cst_11 {dimension_numbers = #tpu.dot_dimension_numbers<[1], [0], [0], [1], [0, 0, 1, 1], [], []>} : vector<8x256xbf16>, vector<256x256xbf16>, vector<8x256xf32> -> vector<8x256xf32>
    %21 = arith.mulf %19, %19 : vector<8x256xf32>
    %22 = arith.subf %20, %21 : vector<8x256xf32>
    %cst_12 = arith.constant 0.000000e+00 : f32
    %23 = vector.broadcast %cst_12 : f32 to vector<8x256xf32>
    %24 = arith.maximumf %22, %23 : vector<8x256xf32>
    %cst_13 = arith.constant 9.99999996E-13 : f32
    %25 = vector.broadcast %cst_13 : f32 to vector<8x256xf32>
    %26 = arith.addf %24, %25 : vector<8x256xf32>
    %27 = math.rsqrt %26 : vector<8x256xf32>
    %28 = arith.subf %14, %19 : vector<8x256xf32>
    %29 = arith.mulf %28, %27 : vector<8x256xf32>
    %c0_14 = arith.constant 0 : index
    %c0_15 = arith.constant 0 : index
    %30 = vector.load %arg4[%c0_14, %c0_15] : memref<1x256xf32, #tpu.memory_space<vmem>>, vector<1x256xf32>
    %31 = vector.broadcast %30 : vector<1x256xf32> to vector<8x256xf32>
    %32 = arith.mulf %29, %31 : vector<8x256xf32>
    %c0_16 = arith.constant 0 : index
    %c0_17 = arith.constant 0 : index
    %33 = vector.load %arg5[%c0_16, %c0_17] : memref<1x256xf32, #tpu.memory_space<vmem>>, vector<1x256xf32>
    %34 = vector.broadcast %33 : vector<1x256xf32> to vector<8x256xf32>
    %35 = arith.addf %32, %34 : vector<8x256xf32>
    %c0_18 = arith.constant 0 : index
    %c0_19 = arith.constant 0 : index
    %36 = vector.load %arg7[%c0_18, %c0_19] : memref<8x256xf32, #tpu.memory_space<vmem>>, vector<8x256xf32>
    tpu.vector_store %arg7[%c0_18, %c0_19], %35 {strides = array<i32>} : memref<8x256xf32, #tpu.memory_space<vmem>>, vector<8x256xf32>,
    return
  }
  func.func @transform_0(%arg0: i32) -> (i32, i32) {
    %c0_i32 = arith.constant 0 : i32
    %c0_i32_0 = arith.constant 0 : i32
    return %arg0, %c0_i32 : i32, i32
  }
  func.func @transform_1(%arg0: i32) -> (i32, i32) {
    %c0_i32 = arith.constant 0 : i32
    %c0_i32_0 = arith.constant 0 : i32
    %c0_i32_1 = arith.constant 0 : i32
    return %c0_i32, %c0_i32_0 : i32, i32
  }
  func.func @transform_2(%arg0: i32) -> (i32, i32) {
    %c0_i32 = arith.constant 0 : i32
    %c0_i32_0 = arith.constant 0 : i32
    %c0_i32_1 = arith.constant 0 : i32
    return %c0_i32, %c0_i32_0 : i32, i32
  }
  func.func @transform_3(%arg0: i32) -> (i32, i32) {
    %c0_i32 = arith.constant 0 : i32
    %c0_i32_0 = arith.constant 0 : i32
    %c0_i32_1 = arith.constant 0 : i32
    return %c0_i32, %c0_i32_0 : i32, i32
  }
  func.func @transform_4(%arg0: i32) -> (i32, i32) {
    %c0_i32 = arith.constant 0 : i32
    %c0_i32_0 = arith.constant 0 : i32
    %c0_i32_1 = arith.constant 0 : i32
    return %c0_i32, %c0_i32_0 : i32, i32
  }
  func.func @transform_5(%arg0: i32) -> (i32, i32) {
    %c0_i32 = arith.constant 0 : i32
    %c0_i32_0 = arith.constant 0 : i32
    %c0_i32_1 = arith.constant 0 : i32
    return %c0_i32, %c0_i32_0 : i32, i32
  }
  func.func @transform_6(%arg0: i32) -> (i32, i32) {
    %c0_i32 = arith.constant 0 : i32
    %c0_i32_0 = arith.constant 0 : i32
    return %arg0, %c0_i32 : i32, i32
  }
}

module attributes {stable_mosaic.version = 11 : i64} {
  func.func @_dense_gelu_ln_packed_kernel(%arg0: i32, %arg1: memref<8x256xf32, #tpu.memory_space<vmem>>, %arg2: memref<256x256xbf16, #tpu.memory_space<vmem>>, %arg3: memref<1x256xf32, #tpu.memory_space<vmem>>, %arg4: memref<1x256xf32, #tpu.memory_space<vmem>>, %arg5: memref<1x256xf32, #tpu.memory_space<vmem>>, %arg6: memref<256x256xbf16, #tpu.memory_space<vmem>>, %arg7: memref<8x256xf32, #tpu.memory_space<vmem>>) attributes {dimension_semantics = [#tpu.dimension_semantics<parallel>], iteration_bounds = array<i64: 1>, scalar_prefetch = 0 : i64, scratch_operands = 0 : i64, tpu.core_type = #tpu.core_type<tc>, window_params = [{transform_indices = @transform_0, window_bounds = array<i64: 8, 256>}, {pipeline_mode = #tpu.pipeline_mode<synchronous>, transform_indices = @transform_1, window_bounds = array<i64: 256, 256>}, {pipeline_mode = #tpu.pipeline_mode<synchronous>, transform_indices = @transform_2, window_bounds = array<i64: 1, 256>}, {pipeline_mode = #tpu.pipeline_mode<synchronous>, transform_indices = @transform_3, window_bounds = array<i64: 1, 256>}, {pipeline_mode = #tpu.pipeline_mode<synchronous>, transform_indices = @transform_4, window_bounds = array<i64: 1, 256>}, {pipeline_mode = #tpu.pipeline_mode<synchronous>, transform_indices = @transform_5, window_bounds = array<i64: 256, 256>}, {transform_indices = @transform_6, window_bounds = array<i64: 8, 256>}]} {
    %c0 = arith.constant 0 : index
    %c0_0 = arith.constant 0 : index
    %0 = vector.load %arg1[%c0, %c0_0] : memref<8x256xf32, #tpu.memory_space<vmem>>, vector<8x256xf32>
    %1 = arith.truncf %0 : vector<8x256xf32> to vector<8x256xbf16>
    %c0_1 = arith.constant 0 : index
    %c0_2 = arith.constant 0 : index
    %2 = vector.load %arg2[%c0_1, %c0_2] : memref<256x256xbf16, #tpu.memory_space<vmem>>, vector<256x256xbf16>
    %cst = arith.constant dense<0.000000e+00> : vector<8x256xf32>
    %3 = tpu.matmul %1, %2, %cst {dimension_numbers = #tpu.dot_dimension_numbers<[1], [0], [0], [1], [0, 0, 1, 1], [], []>} : vector<8x256xbf16>, vector<256x256xbf16>, vector<8x256xf32> -> vector<8x256xf32>
    %c0_3 = arith.constant 0 : index
    %c0_4 = arith.constant 0 : index
    %4 = vector.load %arg3[%c0_3, %c0_4] : memref<1x256xf32, #tpu.memory_space<vmem>>, vector<1x256xf32>
    %5 = vector.broadcast %4 : vector<1x256xf32> to vector<8x256xf32>
    %6 = arith.addf %3, %5 : vector<8x256xf32>
    %cst_5 = arith.constant 5.000000e-01 : f32
    %7 = vector.broadcast %cst_5 : f32 to vector<8x256xf32>
    %8 = arith.mulf %6, %7 : vector<8x256xf32>
    %cst_6 = arith.constant 0.707106769 : f32
    %9 = vector.broadcast %cst_6 : f32 to vector<8x256xf32>
    %10 = arith.mulf %6, %9 : vector<8x256xf32>
    %11 = math.erf %10 : vector<8x256xf32>
    %cst_7 = arith.constant 1.000000e+00 : f32
    %12 = vector.broadcast %cst_7 : f32 to vector<8x256xf32>
    %13 = arith.addf %12, %11 : vector<8x256xf32>
    %14 = arith.mulf %8, %13 : vector<8x256xf32>
    %c0_8 = arith.constant 0 : index
    %c0_9 = arith.constant 0 : index
    %15 = vector.load %arg6[%c0_8, %c0_9] : memref<256x256xbf16, #tpu.memory_space<vmem>>, vector<256x256xbf16>
    %16 = arith.truncf %14 : vector<8x256xf32> to vector<8x256xbf16>
    %17 = arith.mulf %14, %14 : vector<8x256xf32>
    %18 = arith.truncf %17 : vector<8x256xf32> to vector<8x256xbf16>
    %cst_10 = arith.constant dense<0.000000e+00> : vector<8x256xf32>
    %19 = tpu.matmul %16, %15, %cst_10 {dimension_numbers = #tpu.dot_dimension_numbers<[1], [0], [0], [1], [0, 0, 1, 1], [], []>} : vector<8x256xbf16>, vector<256x256xbf16>, vector<8x256xf32> -> vector<8x256xf32>
    %cst_11 = arith.constant dense<0.000000e+00> : vector<8x256xf32>
    %20 = tpu.matmul %18, %15, %cst_11 {dimension_numbers = #tpu.dot_dimension_numbers<[1], [0], [0], [1], [0, 0, 1, 1], [], []>} : vector<8x256xbf16>, vector<256x256xbf16>, vector<8x256xf32> -> vector<8x256xf32>
    %21 = arith.mulf %19, %19 : vector<8x256xf32>
    %22 = arith.subf %20, %21 : vector<8x256xf32>
    %cst_12 = arith.constant 0.000000e+00 : f32
    %23 = vector.broadcast %cst_12 : f32 to vector<8x256xf32>
    %24 = arith.maximumf %22, %23 : vector<8x256xf32>
    %cst_13 = arith.constant 9.99999996E-13 : f32
    %25 = vector.broadcast %cst_13 : f32 to vector<8x256xf32>
    %26 = arith.addf %24, %25 : vector<8x256xf32>
    %27 = math.rsqrt %26 : vector<8x256xf32>
    %28 = arith.subf %14, %19 : vector<8x256xf32>
    %29 = arith.mulf %28, %27 : vector<8x256xf32>
    %c0_14 = arith.constant 0 : index
    %c0_15 = arith.constant 0 : index
    %30 = vector.load %arg4[%c0_14, %c0_15] : memref<1x256xf32, #tpu.memory_space<vmem>>, vector<1x256xf32>
    %31 = vector.broadcast %30 : vector<1x256xf32> to vector<8x256xf32>
    %32 = arith.mulf %29, %31 : vector<8x256xf32>
    %c0_16 = arith.constant 0 : index
    %c0_17 = arith.constant 0 : index
    %33 = vector.load %arg5[%c0_16, %c0_17] : memref<1x256xf32, #tpu.memory_space<vmem>>, vector<1x256xf32>
    %34 = vector.broadcast %33 : vector<1x256xf32> to vector<8x256xf32>
    %35 = arith.addf %32, %34 : vector<8x256xf32>
    %c0_18 = arith.constant 0 : index
    %c0_19 = arith.constant 0 : index
    %36 = vector.load %arg7[%c0_18, %c0_19] : memref<8x256xf32, #tpu.memory_space<vmem>>, vector<8x256xf32>
    tpu.vector_store %arg7[%c0_18, %c0_19], %35 {strides = array<i32>} : memref<8x256xf32, #tpu.memory_space<vmem>>, vector<8x256xf32>,
    return
  }
  func.func @transform_0(%arg0: i32) -> (i32, i32) {
    %c0_i32 = arith.constant 0 : i32
    %c0_i32_0 = arith.constant 0 : i32
    return %arg0, %c0_i32 : i32, i32
  }
  func.func @transform_1(%arg0: i32) -> (i32, i32) {
    %c0_i32 = arith.constant 0 : i32
    %c0_i32_0 = arith.constant 0 : i32
    %c0_i32_1 = arith.constant 0 : i32
    return %c0_i32, %c0_i32_0 : i32, i32
  }
  func.func @transform_2(%arg0: i32) -> (i32, i32) {
    %c0_i32 = arith.constant 0 : i32
    %c0_i32_0 = arith.constant 0 : i32
    %c0_i32_1 = arith.constant 0 : i32
    return %c0_i32, %c0_i32_0 : i32, i32
  }
  func.func @transform_3(%arg0: i32) -> (i32, i32) {
    %c0_i32 = arith.constant 0 : i32
    %c0_i32_0 = arith.constant 0 : i32
    %c0_i32_1 = arith.constant 0 : i32
    return %c0_i32, %c0_i32_0 : i32, i32
  }
  func.func @transform_4(%arg0: i32) -> (i32, i32) {
    %c0_i32 = arith.constant 0 : i32
    %c0_i32_0 = arith.constant 0 : i32
    %c0_i32_1 = arith.constant 0 : i32
    return %c0_i32, %c0_i32_0 : i32, i32
  }
  func.func @transform_5(%arg0: i32) -> (i32, i32) {
    %c0_i32 = arith.constant 0 : i32
    %c0_i32_0 = arith.constant 0 : i32
    %c0_i32_1 = arith.constant 0 : i32
    return %c0_i32, %c0_i32_0 : i32, i32
  }
  func.func @transform_6(%arg0: i32) -> (i32, i32) {
    %c0_i32 = arith.constant 0 : i32
    %c0_i32_0 = arith.constant 0 : i32
    return %arg0, %c0_i32 : i32, i32
  }
}

</mosaic_0001>

<bundles_post_ra>
// kernel: tpu_custom_call.1
= control target key start
LH: loop header
LB: loop body
LE: loop exit
PB: predicated region body
PF: predicated region fallthrough
CT: control target
= control target key end

     0   :  { %11 = vsyncpa [#allocation3], 0  ;;  %s1551_s0 = inlined_call_operand.hbm [shape: f32[8,256], index: 0, kind: input, shape index: {}]   ;;  %s1552_s1 = inlined_call_operand.hbm [shape: bf16[256,256], index: 1, kind: input, shape index: {}]   ;;  %s1553_s2 = inlined_call_operand.hbm [shape: f32[1,256], index: 2, kind: input, shape index: {}]   ;;  %s1554_s3 = inlined_call_operand.vmem [shape: f32[1,256], index: 3, kind: input, shape index: {}]   ;;  %s1555_s4 = inlined_call_operand.hbm [shape: f32[1,256], index: 4, kind: input, shape index: {}]   ;;  %s1556_s5 = inlined_call_operand.hbm [shape: bf16[256,256], index: 5, kind: input, shape index: {}]   ;;  %s1557_s6 = inlined_call_operand.hbm [shape: f32[8,256], index: 6, kind: output, shape index: {}]  }
   0x1   :  { %12 = vsyncpa [#allocation6], 0 }
   0x2   :  { %13 = vsyncpa [#allocation9], 0  ;;  %s30_s23 = sshll.u32 %s1552_s1, 4  ;;  %s31_s23 = int_to_ptr.hbm [resolvable:$true] %s30_s23 }
   0x3   :  { %14 = vsyncpa [#allocation4], 0  ;;  %s1299_s24 = smov [#allocation5]   ;;  %s57_s28 = sshll.u32 %s1555_s4, 4  ;;  %s58_s28 = int_to_ptr.hbm [resolvable:$true] %s57_s28 }
   0x4   :  { %s32_s25 = sshll.u32 %s1299_s24, 4  ;;  %s1300_s29 = smov 128   ;;  %s33_s25 = int_to_ptr.vmem [resolvable:$true] %s32_s25 }
   0x5   :  { %s1301_s30 = smov 8   ;;  %s1302_s7 = smov [#allocation8]  }
   0x6   :  { %38 = dma.hbm_to_vmem [thread:$0]  %s31_s23, 4096, %s33_s25, [#allocation6], %s1300_s29, %s1300_s29, %s1301_s30  }
   0x7   :  { %s59_s8 = sshll.u32 %s1302_s7, 4  ;;  %s20_s11 = sshll.u32 %s1551_s0, 4  ;;  %s60_s8 = int_to_ptr.vmem [resolvable:$true] %s59_s8  ;;  %s21_s11 = int_to_ptr.hbm [resolvable:$true] %s20_s11 }
   0x8   :  { %62 = dma.hbm_to_vmem [thread:$0]  %s58_s28, 32, %s60_s8, [#allocation9]  }
   0x9   :  { %s44_s13 = sshll.u32 %s1553_s2, 4  ;;  %s1303_s14 = smov [#allocation2]   ;;  %s45_s13 = int_to_ptr.hbm [resolvable:$true] %s44_s13 }
   0xa   :  { %s22_s15 = sshll.u32 %s1303_s14, 4  ;;  %s1304_s4 = smov [#allocation7]   ;;  %s23_s15 = int_to_ptr.vmem [resolvable:$true] %s22_s15 }
   0xb   :  { %25 = dma.hbm_to_vmem [thread:$0]  %s21_s11, 256, %s23_s15, [#allocation3]  }
   0xc   :  { %s46_s16 = sshll.u32 %s1304_s4, 4  ;;  %s67_s19 = sshll.u32 %s1556_s5, 4  ;;  %s47_s16 = int_to_ptr.vmem [resolvable:$true] %s46_s16  ;;  %s68_s19 = int_to_ptr.hbm [resolvable:$true] %s67_s19 }
   0xd   :  { %49 = dma.hbm_to_vmem [thread:$0]  %s45_s13, 32, %s47_s16, [#allocation6]  }
   0xe   :  { %s1305_s0 = smov [#allocation10]  }
   0xf   :  { %s69_s20 = sshll.u32 %s1305_s0, 4  ;;  %s70_s20 = int_to_ptr.vmem [resolvable:$true] %s69_s20 }
  0x10   :  { %75 = dma.hbm_to_vmem [thread:$0]  %s68_s19, 4096, %s70_s20, [#allocation9], %s1300_s29, %s1300_s29, %s1301_s30  }
  0x11   :  { %1291 = dma.done.wait [#allocation3], 256  }
  0x12   :  { %1292 = vsyncadd [#allocation3], 4294967040 }
  0x13   :  { %1293 = dma.done.wait [#allocation6], 4128  }
  0x14   :  { %1294 = vsyncadd [#allocation6], 4294963168 }
  0x15   :  { %1295 = dma.done.wait [#allocation9], 4128  }
  0x16   :  { %1296 = vsyncadd [#allocation9], 4294963168  ;;  %v867_v0 = vld [vmem:[#allocation5 + $0x70] sm:$0xf]  ;;  %v1082_v1 = vld [vmem:[#allocation5 + $0x74] sm:$0xf0] }
  0x17   :  { %v931_v2 = vld [vmem:[#allocation5 + $0xf0] sm:$0xf]  ;;  %v868_v3 = vor.u32 %v1082_v1, %v867_v0  ;;  %v1098_v4 = vld [vmem:[#allocation5 + $0xf4] sm:$0xf0]  ;;  %v1081_v5 = vld [vmem:[#allocation5 + $0x74] sm:$0xf] }
  0x18   :  { %v869_v6 = vld [vmem:[#allocation5 + $0x78] sm:$0xf0]  ;;  %v932_v7 = vor.u32 %v1098_v4, %v931_v2  ;;  %v1097_v9 = vld [vmem:[#allocation5 + $0xf4] sm:$0xf]  ;;  %v859_v11 = vld [vmem:[#allocation5 + $0x60] sm:$0xf] }
  0x19   :  { %v872_v8 = vor.u32 %v1081_v5, %v869_v6  ;;  %v933_v10 = vld [vmem:[#allocation5 + $0xf8] sm:$0xf0]  ;;  %298 = vmatpush.bf16.msra.mxu0 %v868_v3  ;;  %v1080_v13 = vld [vmem:[#allocation5 + $0x64] sm:$0xf0]  ;;  %v923_v14 = vld [vmem:[#allocation5 + $0xe0] sm:$0xf] }
  0x1a   :  { %v936_v12 = vor.u32 %v1097_v9, %v933_v10  ;;  %v1096_v15 = vld [vmem:[#allocation5 + $0xe4] sm:$0xf0]  ;;  %311 = vmatpush.bf16.msra.mxu1 %v932_v7  ;;  %v860_v16 = vor.u32 %v1080_v13, %v859_v11  ;;  %v1079_v18 = vld [vmem:[#allocation5 + $0x64] sm:$0xf]  ;;  %v861_v19 = vld [vmem:[#allocation5 + $0x68] sm:$0xf0] }
  0x1b   :  { %324 = vmatpush.bf16.msra.mxu2 %v872_v8  ;;  %v924_v17 = vor.u32 %v1096_v15, %v923_v14  ;;  %v1095_v20 = vld [vmem:[#allocation5 + $0xe4] sm:$0xf]  ;;  %v864_v21 = vor.u32 %v1079_v18, %v861_v19  ;;  %v925_v22 = vld [vmem:[#allocation5 + $0xe8] sm:$0xf0]  ;;  %v851_v23 = vld [vmem:[#allocation5 + $0x50] sm:$0xf] }
  0x1c   :  { %337 = vmatpush.bf16.msra.mxu3 %v936_v12  ;;  %v1078_v24 = vld [vmem:[#allocation5 + $0x54] sm:$0xf0]  ;;  %v928_v25 = vor.u32 %v1095_v20, %v925_v22  ;;  %v915_v26 = vld [vmem:[#allocation5 + $0xd0] sm:$0xf]  ;;  %v1077_v28 = vld [vmem:[#allocation5 + $0x54] sm:$0xf] }
  0x1d   :  { %v1094_v27 = vld [vmem:[#allocation5 + $0xd4] sm:$0xf0]  ;;  %299 = vmatpush.bf16.msra.mxu0 %v860_v16  ;;  %v852_v29 = vor.u32 %v1078_v24, %v851_v23  ;;  %v853_v30 = vld [vmem:[#allocation5 + $0x58] sm:$0xf0]  ;;  %v1093_v31 = vld [vmem:[#allocation5 + $0xd4] sm:$0xf] }
  0x1e   :  { %v917_v32 = vld [vmem:[#allocation5 + $0xd8] sm:$0xf0]  ;;  %312 = vmatpush.bf16.msra.mxu1 %v924_v17  ;;  %v916_v33 = vor.u32 %v1094_v27, %v915_v26  ;;  %v856_v34 = vor.u32 %v1077_v28, %v853_v30  ;;  %v843_v35 = vld [vmem:[#allocation5 + $0x40] sm:$0xf]  ;;  %v1076_v36 = vld [vmem:[#allocation5 + $0x44] sm:$0xf0] }
  0x1f   :  { %325 = vmatpush.bf16.msra.mxu2 %v864_v21  ;;  %v907_v37 = vld [vmem:[#allocation5 + $0xc0] sm:$0xf]  ;;  %v920_v38 = vor.u32 %v1093_v31, %v917_v32  ;;  %v1092_v39 = vld [vmem:[#allocation5 + $0xc4] sm:$0xf0]  ;;  %v1075_v40 = vld [vmem:[#allocation5 + $0x44] sm:$0xf]  ;;  %v844_v44 = vor.u32 %v1076_v36, %v843_v35 }
  0x20   :  { %338 = vmatpush.bf16.msra.mxu3 %v928_v25  ;;  %v845_v41 = vld [vmem:[#allocation5 + $0x48] sm:$0xf0]  ;;  %v1091_v42 = vld [vmem:[#allocation5 + $0xc4] sm:$0xf]  ;;  %v908_v45 = vor.u32 %v1092_v39, %v907_v37  ;;  %v835_v47 = vld [vmem:[#allocation5 + $0x30] sm:$0xf] }
  0x21   :  { %v909_v43 = vld [vmem:[#allocation5 + $0xc8] sm:$0xf0]  ;;  %300 = vmatpush.bf16.msra.mxu0 %v852_v29  ;;  %v848_v46 = vor.u32 %v1075_v40, %v845_v41  ;;  %v1074_v48 = vld [vmem:[#allocation5 + $0x34] sm:$0xf0]  ;;  %v899_v49 = vld [vmem:[#allocation5 + $0xb0] sm:$0xf] }
  0x22   :  { %313 = vmatpush.bf16.msra.mxu1 %v916_v33  ;;  %v912_v50 = vor.u32 %v1091_v42, %v909_v43  ;;  %v1090_v51 = vld [vmem:[#allocation5 + $0xb4] sm:$0xf0]  ;;  %v1073_v52 = vld [vmem:[#allocation5 + $0x34] sm:$0xf]  ;;  %v837_v53 = vld [vmem:[#allocation5 + $0x38] sm:$0xf0]  ;;  %v836_v56 = vor.u32 %v1074_v48, %v835_v47 }
  0x23   :  { %326 = vmatpush.bf16.msra.mxu2 %v856_v34  ;;  %v1089_v54 = vld [vmem:[#allocation5 + $0xb4] sm:$0xf]  ;;  %v901_v55 = vld [vmem:[#allocation5 + $0xb8] sm:$0xf0]  ;;  %v900_v57 = vor.u32 %v1090_v51, %v899_v49  ;;  %v840_v58 = vor.u32 %v1073_v52, %v837_v53  ;;  %v827_v59 = vld [vmem:[#allocation5 + $0x20] sm:$0xf] }
  0x24   :  { %339 = vmatpush.bf16.msra.mxu3 %v920_v38  ;;  %v1072_v60 = vld [vmem:[#allocation5 + $0x24] sm:$0xf0]  ;;  %v891_v61 = vld [vmem:[#allocation5 + $0xa0] sm:$0xf]  ;;  %v904_v62 = vor.u32 %v1089_v54, %v901_v55  ;;  %v1071_v0 = vld [vmem:[#allocation5 + $0x24] sm:$0xf] }
  0x25   :  { %301 = vmatpush.bf16.msra.mxu0 %v844_v44  ;;  %v1088_v63 = vld [vmem:[#allocation5 + $0xa4] sm:$0xf0]  ;;  %v829_v1 = vld [vmem:[#allocation5 + $0x28] sm:$0xf0]  ;;  %v1087_v2 = vld [vmem:[#allocation5 + $0xa4] sm:$0xf]  ;;  %v828_v4 = vor.u32 %v1072_v60, %v827_v59 }
  0x26   :  { %314 = vmatpush.bf16.msra.mxu1 %v908_v45  ;;  %v893_v3 = vld [vmem:[#allocation5 + $0xa8] sm:$0xf0]  ;;  %v892_v5 = vor.u32 %v1088_v63, %v891_v61  ;;  %v832_v6 = vor.u32 %v1071_v0, %v829_v1  ;;  %v819_v7 = vld [vmem:[#allocation5 + $0x10] sm:$0xf]  ;;  %v1070_v8 = vld [vmem:[#allocation5 + $0x14] sm:$0xf0] }
  0x27   :  { %327 = vmatpush.bf16.msra.mxu2 %v848_v46  ;;  %v883_v9 = vld [vmem:[#allocation5 + $0x90] sm:$0xf]  ;;  %v896_v10 = vor.u32 %v1087_v2, %v893_v3  ;;  %v1086_v11 = vld [vmem:[#allocation5 + $0x94] sm:$0xf0]  ;;  %v1069_v12 = vld [vmem:[#allocation5 + $0x14] sm:$0xf]  ;;  %v820_v16 = vor.u32 %v1070_v8, %v819_v7 }
  0x28   :  { %340 = vmatpush.bf16.msra.mxu3 %v912_v50  ;;  %v821_v13 = vld [vmem:[#allocation5 + $0x18] sm:$0xf0]  ;;  %v1085_v14 = vld [vmem:[#allocation5 + $0x94] sm:$0xf]  ;;  %v884_v17 = vor.u32 %v1086_v11, %v883_v9  ;;  %v811_v19 = vld [vmem:[#allocation5] sm:$0xf] }
  0x29   :  { %302 = vmatpush.bf16.msra.mxu0 %v836_v56  ;;  %v885_v15 = vld [vmem:[#allocation5 + $0x98] sm:$0xf0]  ;;  %v824_v18 = vor.u32 %v1069_v12, %v821_v13  ;;  %v1068_v20 = vld [vmem:[#allocation5 + $0x4] sm:$0xf0]  ;;  %v875_v21 = vld [vmem:[#allocation5 + $0x80] sm:$0xf] }
  0x2a   :  { %315 = vmatpush.bf16.msra.mxu1 %v900_v57  ;;  %v888_v22 = vor.u32 %v1085_v14, %v885_v15  ;;  %v1084_v23 = vld [vmem:[#allocation5 + $0x84] sm:$0xf0]  ;;  %v1067_v24 = vld [vmem:[#allocation5 + $0x4] sm:$0xf]  ;;  %v813_v25 = vld [vmem:[#allocation5 + $0x8] sm:$0xf0]  ;;  %v812_v28 = vor.u32 %v1068_v20, %v811_v19 }
  0x2b   :  { %328 = vmatpush.bf16.msra.mxu2 %v840_v58  ;;  %v1083_v26 = vld [vmem:[#allocation5 + $0x84] sm:$0xf]  ;;  %v877_v27 = vld [vmem:[#allocation5 + $0x88] sm:$0xf0]  ;;  %v96_v29 = vld [vmem:[#allocation2] sm:$0xff]  ;;  %v876_v30 = vor.u32 %v1084_v23, %v875_v21  ;;  %v816_v31 = vor.u32 %v1067_v24, %v813_v25  ;;  %s797_s24 = sshll.u32 %s1557_s6, 4  ;;  %s798_s24 = int_to_ptr.hbm [resolvable:$true] %s797_s24 }
  0x2c   :  { %341 = vmatpush.bf16.msra.mxu3 %v904_v62  ;;  %v97_v32 = vld [vmem:[#allocation2 + $0x8] sm:$0xff]  ;;  %v880_v33 = vor.u32 %v1083_v26, %v877_v27  ;;  %v98_v34 = vpack.c.bf16 %v96_v29, %v96_v29  ;;  %v997_v36 = vld [vmem:[#allocation10 + $0x70] sm:$0xf]  ;;  %v999_v40 = vld [vmem:[#allocation10 + $0x78] sm:$0xf0] }
  0x2d   :  { %303 = vmatpush.bf16.msra.mxu0 %v828_v4  ;;  %v99_v35 = vpack.c.bf16 %v97_v32, %v97_v32  ;;  %v1114_v37 = vld [vmem:[#allocation10 + $0x74] sm:$0xf0]  ;;  %v1113_v38 = vld [vmem:[#allocation10 + $0x74] sm:$0xf]  ;;  %v989_v42 = vld [vmem:[#allocation10 + $0x60] sm:$0xf] }
  0x2e   :  { %316 = vmatpush.bf16.msra.mxu1 %v892_v5  ;;  %v1357_v39 = vor.u32 %v1114_v37, %v997_v36  ;;  %v1359_v41 = vor.u32 %v1113_v38, %v999_v40  ;;  %v1112_v43 = vld [vmem:[#allocation10 + $0x64] sm:$0xf0]  ;;  %v1111_v44 = vld [vmem:[#allocation10 + $0x64] sm:$0xf]  ;;  %v991_v46 = vld [vmem:[#allocation10 + $0x68] sm:$0xf0] }
  0x2f   :  { %329 = vmatpush.bf16.msra.mxu2 %v832_v6  ;;  %v1363_v45 = vor.u32 %v1112_v43, %v989_v42  ;;  %v1365_v47 = vor.u32 %v1111_v44, %v991_v46  ;;  %v1061_v48 = vld [vmem:[#allocation10 + $0xf0] sm:$0xf]  ;;  %v1130_v49 = vld [vmem:[#allocation10 + $0xf4] sm:$0xf0]  ;;  %v1129_v50 = vld [vmem:[#allocation10 + $0xf4] sm:$0xf] }
  0x30   :  { %342 = vmatpush.bf16.msra.mxu3 %v896_v10  ;;  %v1368_v51 = vor.u32 %v1130_v49, %v1061_v48  ;;  %v1063_v52 = vld [vmem:[#allocation10 + $0xf8] sm:$0xf0]  ;;  %v981_v54 = vld [vmem:[#allocation10 + $0x50] sm:$0xf]  ;;  %v1110_v55 = vld [vmem:[#allocation10 + $0x54] sm:$0xf0] }
  0x31   :  { %304 = vmatpush.bf16.msra.mxu0 %v820_v16  ;;  %v1371_v53 = vor.u32 %v1129_v50, %v1063_v52  ;;  %v1109_v56 = vld [vmem:[#allocation10 + $0x54] sm:$0xf]  ;;  %v1374_v57 = vor.u32 %v1110_v55, %v981_v54  ;;  %v983_v58 = vld [vmem:[#allocation10 + $0x58] sm:$0xf0]  ;;  %v1053_v60 = vld [vmem:[#allocation10 + $0xe0] sm:$0xf] }
  0x32   :  { %317 = vmatpush.bf16.msra.mxu1 %v884_v17  ;;  %v1377_v59 = vor.u32 %v1109_v56, %v983_v58  ;;  %v1128_v61 = vld [vmem:[#allocation10 + $0xe4] sm:$0xf0]  ;;  %v1127_v62 = vld [vmem:[#allocation10 + $0xe4] sm:$0xf]  ;;  %v1379_v63 = vld [vmem:[#allocation7] sm:$0x3] }
  0x33   :  { %330 = vmatpush.bf16.msra.mxu2 %v824_v18  ;;  %v1382_v0 = vor.u32 %v1128_v61, %v1053_v60  ;;  %v1055_v1 = vld [vmem:[#allocation10 + $0xe8] sm:$0xf0]  ;;  %v973_v3 = vld [vmem:[#allocation10 + $0x40] sm:$0xf]  ;;  %v1108_v4 = vld [vmem:[#allocation10 + $0x44] sm:$0xf0] }
  0x34   :  { %343 = vmatpush.bf16.msra.mxu3 %v888_v22  ;;  %v1385_v2 = vor.u32 %v1127_v62, %v1055_v1  ;;  %v1107_v5 = vld [vmem:[#allocation10 + $0x44] sm:$0xf]  ;;  %v1388_v6 = vor.u32 %v1108_v4, %v973_v3  ;;  %v975_v7 = vld [vmem:[#allocation10 + $0x48] sm:$0xf0]  ;;  %v1045_v9 = vld [vmem:[#allocation10 + $0xd0] sm:$0xf] }
  0x35   :  { %305 = vmatpush.bf16.msra.mxu0 %v812_v28  ;;  %v1391_v8 = vor.u32 %v1107_v5, %v975_v7  ;;  %v1126_v10 = vld [vmem:[#allocation10 + $0xd4] sm:$0xf0]  ;;  %v1125_v11 = vld [vmem:[#allocation10 + $0xd4] sm:$0xf]  ;;  %v134_v12 = vperm.slane %v1379_v63, 0  ;;  %v135_v43 = vperm.slane %v1379_v63, 1 }
  0x36   :  { %318 = vmatpush.bf16.msra.mxu1 %v876_v30  ;;  %v1395_v13 = vor.u32 %v1126_v10, %v1045_v9  ;;  %v1047_v14 = vld [vmem:[#allocation10 + $0xd8] sm:$0xf0]  ;;  %v965_v16 = vld [vmem:[#allocation10 + $0x30] sm:$0xf]  ;;  %v1106_v17 = vld [vmem:[#allocation10 + $0x34] sm:$0xf0] }
  0x37   :  { %331 = vmatpush.bf16.msra.mxu2 %v816_v31  ;;  %v1398_v15 = vor.u32 %v1125_v11, %v1047_v14  ;;  %v1105_v18 = vld [vmem:[#allocation10 + $0x34] sm:$0xf]  ;;  %v1401_v19 = vor.u32 %v1106_v17, %v965_v16  ;;  %v967_v20 = vld [vmem:[#allocation10 + $0x38] sm:$0xf0]  ;;  %v1037_v22 = vld [vmem:[#allocation10 + $0xc0] sm:$0xf] }
  0x38   :  { %344 = vmatpush.bf16.msra.mxu3 %v880_v33  ;;  %306 = vmatmul.bf16.vlgmr.msra.gmra.mxu0 %v98_v34  ;;  %v1404_v21 = vor.u32 %v1105_v18, %v967_v20  ;;  %v1124_v23 = vld [vmem:[#allocation10 + $0xc4] sm:$0xf0]  ;;  %v1123_v24 = vld [vmem:[#allocation10 + $0xc4] sm:$0xf]  ;;  %v1039_v27 = vld [vmem:[#allocation10 + $0xc8] sm:$0xf0] }
  0x39   :  { %319 = vmatmul.bf16.vlgmr.msra.gmra.mxu1 %v99_v35  ;;  %636 = vmatpush.bf16.msrb.mxu0 %v1357_v39  ;;  %v1407_v26 = vor.u32 %v1124_v23, %v1037_v22  ;;  %v1410_v30 = vor.u32 %v1123_v24, %v1039_v27  ;;  %v957_v31 = vld [vmem:[#allocation10 + $0x20] sm:$0xf]  ;;  %v1104_v32 = vld [vmem:[#allocation10 + $0x24] sm:$0xf0]  ;;  %v1103_v33 = vld [vmem:[#allocation10 + $0x24] sm:$0xf] }
  0x3a   :  { %332 = vmatmul.bf16.vlgmr.msra.gmra.mxu2 %v98_v34  ;;  %649 = vmatpush.bf16.msrb.mxu1 %v1368_v51  ;;  %v1413_v34 = vor.u32 %v1104_v32, %v957_v31  ;;  %v1029_v38 = vld [vmem:[#allocation10 + $0xb0] sm:$0xf]  ;;  %v1122_v40 = vld [vmem:[#allocation10 + $0xb4] sm:$0xf0]  ;;  %v1121_v42 = vld [vmem:[#allocation10 + $0xb4] sm:$0xf] }
  0x3b   :  { %345 = vmatmul.bf16.vlgmr.msra.gmra.mxu3 %v99_v35  ;;  %662 = vmatpush.bf16.msrb.mxu2 %v1359_v41  ;;  %v959_v35 = vld [vmem:[#allocation10 + $0x28] sm:$0xf0]  ;;  %v1422_v44 = vor.u32 %v1122_v40, %v1029_v38  ;;  %v1031_v46 = vld [vmem:[#allocation10 + $0xb8] sm:$0xf0]  ;;  %v949_v50 = vld [vmem:[#allocation10 + $0x10] sm:$0xf] }
  0x3c   :  { %675 = vmatpush.bf16.msrb.mxu3 %v1371_v53  ;;  %v1418_v37 = vor.u32 %v1103_v33, %v959_v35  ;;  %v1428_v49 = vor.u32 %v1121_v42, %v1031_v46  ;;  %v1102_v52 = vld [vmem:[#allocation10 + $0x14] sm:$0xf0]  ;;  %v1101_v54 = vld [vmem:[#allocation10 + $0x14] sm:$0xf]  ;;  %v951_v55 = vld [vmem:[#allocation10 + $0x18] sm:$0xf0] }
  0x3d   :  { %637 = vmatpush.bf16.msrb.mxu0 %v1363_v45  ;;  %v1434_v60 = vor.u32 %v1102_v52, %v949_v50  ;;  %v1436_v61 = vor.u32 %v1101_v54, %v951_v55  ;;  %v1021_v62 = vld [vmem:[#allocation10 + $0xa0] sm:$0xf]  ;;  %v1120_v63 = vld [vmem:[#allocation10 + $0xa4] sm:$0xf0]  ;;  %v1119_v1 = vld [vmem:[#allocation10 + $0xa4] sm:$0xf] }
  0x3e   :  { %650 = vmatpush.bf16.msrb.mxu1 %v1382_v0  ;;  %v1438_v7 = vor.u32 %v1120_v63, %v1021_v62  ;;  %v1023_v9 = vld [vmem:[#allocation10 + $0xa8] sm:$0xf0]  ;;  %v941_v14 = vld [vmem:[#allocation10] sm:$0xf]  ;;  %v1100_v16 = vld [vmem:[#allocation10 + $0x4] sm:$0xf0] }
  0x3f   :  { %663 = vmatpush.bf16.msrb.mxu2 %v1365_v47  ;;  %v1449_v18 = vor.u32 %v1100_v16, %v941_v14  ;;  %v1099_v20 = vld [vmem:[#allocation10 + $0x4] sm:$0xf]  ;;  %v943_v22 = vld [vmem:[#allocation10 + $0x8] sm:$0xf0]  ;;  %v1013_v27 = vld [vmem:[#allocation10 + $0x90] sm:$0xf] }
  0x40   :  { %676 = vmatpush.bf16.msrb.mxu3 %v1385_v2  ;;  %v1117_v35 = vld [vmem:[#allocation10 + $0x94] sm:$0xf]  ;;  %v1015_v40 = vld [vmem:[#allocation10 + $0x98] sm:$0xf0]  ;;  %v1005_v52 = vld [vmem:[#allocation10 + $0x80] sm:$0xf] }
  0x41   :  { %638 = vmatpush.bf16.msrb.mxu0 %v1374_v57  ;;  %v1470_v50 = vor.u32 %v1117_v35, %v1015_v40  ;;  %v1116_v54 = vld [vmem:[#allocation10 + $0x84] sm:$0xf0]  ;;  %v1115_v55 = vld [vmem:[#allocation10 + $0x84] sm:$0xf] }
  0x42   :  { %651 = vmatpush.bf16.msrb.mxu1 %v1395_v13  ;;  %v1474_v62 = vor.u32 %v1116_v54, %v1005_v52 }
  0x43   :  { %664 = vmatpush.bf16.msrb.mxu2 %v1377_v59 }
  0x44   :  { %677 = vmatpush.bf16.msrb.mxu3 %v1398_v15 }
  0x45   :  { %639 = vmatpush.bf16.msrb.mxu0 %v1388_v6 }
  0x46   :  { %652 = vmatpush.bf16.msrb.mxu1 %v1407_v26 }
  0x47   :  { %665 = vmatpush.bf16.msrb.mxu2 %v1391_v8 }
  0x48   :  { %678 = vmatpush.bf16.msrb.mxu3 %v1410_v30 }
  0x49   :  { %640 = vmatpush.bf16.msrb.mxu0 %v1401_v19 }
  0x4a   :  { %653 = vmatpush.bf16.msrb.mxu1 %v1422_v44 }
  0x4b   :  { %666 = vmatpush.bf16.msrb.mxu2 %v1404_v21 }
  0x4c   :  { %679 = vmatpush.bf16.msrb.mxu3 %v1428_v49 }
  0x4d   :  { %641 = vmatpush.bf16.msrb.mxu0 %v1413_v34 }
  0x4e   :  { %654 = vmatpush.bf16.msrb.mxu1 %v1438_v7 }
  0x4f   :  { %667 = vmatpush.bf16.msrb.mxu2 %v1418_v37 }
  0x51   :  { %642 = vmatpush.bf16.msrb.mxu0 %v1434_v60 }
  0x53   :  { %668 = vmatpush.bf16.msrb.mxu2 %v1436_v61 }
  0x55   :  { %643 = vmatpush.bf16.msrb.mxu0 %v1449_v18 }
  0x59   :  { %688 = vmatpush.bf16.msra.mxu0 %v1357_v39  ;;  %v1007_v39 = vld [vmem:[#allocation10 + $0x88] sm:$0xf0] }
  0x5a   :  { %v1477_v63 = vor.u32 %v1115_v55, %v1007_v39 }
  0x5d   :  { %689 = vmatpush.bf16.msra.mxu0 %v1363_v45 }
  0x61   :  { %690 = vmatpush.bf16.msra.mxu0 %v1374_v57 }
  0x65   :  { %691 = vmatpush.bf16.msra.mxu0 %v1388_v6 }
  0x69   :  { %692 = vmatpush.bf16.msra.mxu0 %v1401_v19 }
  0x6d   :  { %693 = vmatpush.bf16.msra.mxu0 %v1413_v34 }
  0x71   :  { %694 = vmatpush.bf16.msra.mxu0 %v1434_v60 }
  0x75   :  { %695 = vmatpush.bf16.msra.mxu0 %v1449_v18 }
  0xb5   :  { %v307_v25 = vpop.f32.mrf.mxu0 }
  0xb6   :  { %v308_v28 = vadd.f32 %v307_v25, %v134_v12  ;;  %v320_v29 = vpop.f32.mrf.mxu1  ;;  %v1444_v12 = vor.u32 %v1119_v1, %v1023_v9  ;;  %v1454_v25 = vor.u32 %v1099_v20, %v943_v22 }
  0xb8   :  { %v1415_v36 = vadd.f32 %v320_v29, %v308_v28  ;;  %680 = vmatpush.bf16.msrb.mxu3 %v1444_v12  ;;  %v1118_v29 = vld [vmem:[#allocation10 + $0x94] sm:$0xf0]  ;;  %669 = vmatpush.bf16.msrb.mxu2 %v1454_v25 }
  0xb9   :  { %v1461_v33 = vor.u32 %v1118_v29, %v1013_v27 }
  0xba   :  { %v1425_v48 = vmul.f32 0.70710677, %v1415_v36 }
  0xbb   :  { %655 = vmatpush.bf16.msrb.mxu1 %v1461_v33 }
  0xbc   :  { %v354_v56 = vmul.f32 %v1425_v48, %v1425_v48  ;;  %714 = vmatpush.bf16.msra.mxu2 %v1359_v41  ;;  %681 = vmatpush.bf16.msrb.mxu3 %v1470_v50 }
  0xbd   :  { %v333_v58 = vpop.f32.mrf.mxu2  ;;  %v309_v5 = vpop.f32.mrf.mxu0 }
  0xbe   :  { %v334_v3 = vadd.f32 %v333_v58, %v135_v43  ;;  %v346_v4 = vpop.f32.mrf.mxu3  ;;  %v1440_v10 = vmin.f32 %v354_v56, 16.0  ;;  %v322_v11 = vpop.f32.mrf.mxu1 }
  0xbf   :  { %656 = vmatpush.bf16.msrb.mxu1 %v1474_v62 }
  0xc0   :  { %v1446_v17 = vadd.f32 %v346_v4, %v334_v3  ;;  %v356_v23 = vmul.f32 2.1237322e-06, %v1440_v10  ;;  %v367_v24 = vmul.f32 3.8918573e-05, %v1440_v10  ;;  %715 = vmatpush.bf16.msra.mxu2 %v1365_v47  ;;  %682 = vmatpush.bf16.msrb.mxu3 %v1477_v63 }
  0xc2   :  { %v1457_v28 = vmul.f32 0.70710677, %v1446_v17  ;;  %v357_v31 = vadd.f32 0.00028619796, %v356_v23  ;;  %v368_v32 = vadd.f32 0.001143296, %v367_v24 }
  0xc3   :  { %701 = vmatpush.bf16.msra.mxu1 %v1368_v51 }
  0xc4   :  { %v394_v38 = vmul.f32 %v1457_v28, %v1457_v28  ;;  %v358_v42 = vmul.f32 %v357_v31, %v1440_v10  ;;  %v369_v43 = vmul.f32 %v368_v32, %v1440_v10  ;;  %727 = vmatpush.bf16.msra.mxu3 %v1371_v53  ;;  %716 = vmatpush.bf16.msra.mxu2 %v1377_v59 }
  0xc5   :  { %v335_v46 = vpop.f32.mrf.mxu2 }
  0xc6   :  { %v1472_v56 = vmin.f32 %v394_v38, 16.0  ;;  %v348_v58 = vpop.f32.mrf.mxu3  ;;  %v370_v41 = vadd.f32 0.014752088, %v369_v43  ;;  %v359_v1 = vadd.f32 0.0036580483, %v358_v42 }
  0xc7   :  { %702 = vmatpush.bf16.msra.mxu1 %v1382_v0 }
  0xc8   :  { %v396_v3 = vmul.f32 2.1237322e-06, %v1472_v56  ;;  %v407_v4 = vmul.f32 3.8918573e-05, %v1472_v56  ;;  %v371_v5 = vmul.f32 %v370_v41, %v1440_v10  ;;  %v360_v16 = vmul.f32 %v359_v1, %v1440_v10  ;;  %728 = vmatpush.bf16.msra.mxu3 %v1385_v2  ;;  %717 = vmatpush.bf16.msra.mxu2 %v1391_v8 }
  0xca   :  { %v397_v9 = vadd.f32 0.00028619796, %v396_v3  ;;  %v408_v11 = vadd.f32 0.001143296, %v407_v4  ;;  %v372_v14 = vadd.f32 0.112945676, %v371_v5 }
  0xcb   :  { %v361_v24 = vadd.f32 0.05243302, %v360_v16  ;;  %703 = vmatpush.bf16.msra.mxu1 %v1395_v13 }
  0xcc   :  { %v398_v20 = vmul.f32 %v397_v9, %v1472_v56  ;;  %v409_v22 = vmul.f32 %v408_v11, %v1472_v56  ;;  %v373_v45 = vmul.f32 %v372_v14, %v1440_v10  ;;  %729 = vmatpush.bf16.msra.mxu3 %v1398_v15  ;;  %718 = vmatpush.bf16.msra.mxu2 %v1404_v21 }
  0xcd   :  { %v362_v0 = vmul.f32 %v361_v24, %v1440_v10 }
  0xce   :  { %v410_v47 = vadd.f32 0.014752088, %v409_v22  ;;  %v374_v51 = vadd.f32 0.4994258, %v373_v45  ;;  %v399_v23 = vadd.f32 0.0036580483, %v398_v20 }
  0xcf   :  { %704 = vmatpush.bf16.msra.mxu1 %v1407_v26  ;;  %v363_v8 = vadd.f32 0.18741608, %v362_v0 }
  0xd0   :  { %v411_v27 = vmul.f32 %v410_v47, %v1472_v56  ;;  %v375_v53 = vmul.f32 %v374_v51, %v1440_v10  ;;  %v400_v29 = vmul.f32 %v399_v23, %v1472_v56  ;;  %730 = vmatpush.bf16.msra.mxu3 %v1410_v30  ;;  %719 = vmatpush.bf16.msra.mxu2 %v1418_v37 }
  0xd1   :  { %v364_v21 = vmul.f32 %v363_v8, %v1440_v10 }
  0xd2   :  { %v412_v57 = vadd.f32 0.112945676, %v411_v27  ;;  %v376_v59 = vadd.f32 1.0, %v375_v53  ;;  %v401_v6 = vadd.f32 0.05243302, %v400_v29 }
  0xd3   :  { %705 = vmatpush.bf16.msra.mxu1 %v1422_v44  ;;  %v365_v37 = vadd.f32 1.1283791, %v364_v21 }
  0xd4   :  { %v413_v31 = vmul.f32 %v412_v57, %v1472_v56  ;;  %1139 = vrcp.f32 %v376_v59  ;;  %v402_v19 = vmul.f32 %v401_v6, %v1472_v56  ;;  %731 = vmatpush.bf16.msra.mxu3 %v1428_v49  ;;  %720 = vmatpush.bf16.msra.mxu2 %v1436_v61  ;;  %v388_v30 = vand.u32 2147483648, %v376_v59 }
  0xd5   :  { %v386_v38 = vand.u32 2147483647, %v376_v59  ;;  %vm382_vm1 = vweird.f32 %v376_v59  ;;  %v366_v40 = vmul.f32 %v365_v37, %v1425_v48  ;;  %v350_v48 = vmul.f32 0.5, %v1415_v36 }
  0xd6   :  { %v414_v2 = vadd.f32 0.4994258, %v413_v31  ;;  %v403_v34 = vadd.f32 0.18741608, %v402_v19  ;;  %v389_v60 = vor.u32 1.1754944e-38, %v388_v30 }
  0xd7   :  { %706 = vmatpush.bf16.msra.mxu1 %v1438_v7  ;;  %vm387_vm3 = vcmp.eq.f32.partialorder %v386_v38, 8.507059e+37 }
  0xd8   :  { %v415_v13 = vmul.f32 %v414_v2, %v1472_v56  ;;  %732 = vmatpush.bf16.msra.mxu3 %v1444_v12  ;;  %721 = vmatpush.bf16.msra.mxu2 %v1454_v25  ;;  %v404_v61 = vmul.f32 %v403_v34, %v1472_v56 }
  0xda   :  { %v416_v32 = vadd.f32 1.0, %v415_v13  ;;  %v1140_v15 = vpop.eup %1139  ;;  %v405_v46 = vadd.f32 1.1283791, %v404_v61 }
  0xdb   :  { %v378_v35 = vmul.f32 %v1140_v15, %v376_v59  ;;  %vm383_vm0 = vweird.f32 %v1140_v15  ;;  %707 = vmatpush.bf16.msra.mxu1 %v1461_v33 }
  0xdc   :  { %1141 = vrcp.f32 %v416_v32  ;;  %vm384_vm2 = vmor %vm382_vm1, %vm383_vm0  ;;  %733 = vmatpush.bf16.msra.mxu3 %v1470_v50  ;;  %v428_v25 = vand.u32 2147483648, %v416_v32  ;;  %v426_v33 = vand.u32 2147483647, %v416_v32  ;;  %vm422_vm5 = vweird.f32 %v416_v32 }
  0xdd   :  { %v379_v26 = vsub.f32 1.0, %v378_v35  ;;  %v406_v58 = vmul.f32 %v405_v46, %v1457_v28 }
  0xde   :  { %v429_v50 = vor.u32 1.1754944e-38, %v428_v25  ;;  %vm427_vm7 = vcmp.eq.f32.partialorder %v426_v33, 8.507059e+37 }
  0xdf   :  { %v380_v44 = vmul.f32 %v1140_v15, %v379_v26  ;;  %708 = vmatpush.bf16.msra.mxu1 %v1474_v62 }
  0xe0   :  { %734 = vmatpush.bf16.msra.mxu3 %v1477_v63  ;;  %v351_v63 = vmul.f32 0.5, %v1446_v17 }
  0xe1   :  { %v381_v10 = vadd.f32 %v1140_v15, %v380_v44 }
  0xe2   :  { %v1142_v49 = vpop.eup %1141 }
  0xe3   :  { %v418_v7 = vmul.f32 %v1142_v49, %v416_v32  ;;  %v385_v42 = vsel %vm384_vm2, %v1140_v15, %v381_v10  ;;  %vm423_vm4 = vweird.f32 %v1142_v49 }
  0xe4   :  { %v390_v12 = vsel %vm387_vm3, %v389_v60, %v385_v42  ;;  %vm424_vm6 = vmor %vm422_vm5, %vm423_vm4 }
  0xe5   :  { %v419_v18 = vsub.f32 1.0, %v418_v7  ;;  %v391_v43 = vmul.f32 %v390_v12, %v366_v40  ;;  %v772_v40 = vld [vmem:[%s1554_s3] sm:$0x3]  ;;  %s1306_s3 = smov [#allocation11]  }
  0xe6   :  { %v774_v25 = vperm.slane %v772_v40, 0  ;;  %s795_s21 = sshll.u32 %s1306_s3, 4  ;;  %s796_s21 = int_to_ptr.vmem [resolvable:$true] %s795_s21 }
  0xe7   :  { %v420_v52 = vmul.f32 %v1142_v49, %v419_v18  ;;  %v937_v54 = vclamps-f32 %v391_v43, 1.0  ;;  %v780_v18 = vld [vmem:[#allocation8] sm:$0x3] }
  0xe9   :  { %v421_v55 = vadd.f32 %v1142_v49, %v420_v52  ;;  %v434_v56 = vadd.f32 1.0, %v937_v54  ;;  %v782_v54 = vperm.slane %v780_v18, 0 }
  0xeb   :  { %v425_v39 = vsel %vm424_vm6, %v1142_v49, %v421_v55  ;;  %v1530_v41 = vmul.f32 %v434_v56, %v350_v48 }
  0xec   :  { %v430_v62 = vsel %vm427_vm7, %v429_v50, %v425_v39 }
  0xed   :  { %v431_v1 = vmul.f32 %v430_v62, %v406_v58  ;;  %v470_v3 = vpack.c.bf16 %v1530_v41, %v1530_v41  ;;  %v472_v9 = vmul.f32 %v1530_v41, %v1530_v41  ;;  %v775_v58 = vperm.slane %v772_v40, 1 }
  0xef   :  { %v938_v4 = vclamps-f32 %v431_v1, 1.0  ;;  %644 = vmatmul.bf16.vlgmr.msrb.gmra.mxu0 %v470_v3  ;;  %670 = vmatmul.bf16.vlgmr.msrb.gmra.mxu2 %v470_v3  ;;  %v474_v11 = vpack.c.bf16 %v472_v9, %v472_v9  ;;  %v783_v3 = vperm.slane %v780_v18, 1 }
  0xf1   :  { %v435_v36 = vadd.f32 1.0, %v938_v4 }
  0xf3   :  { %v1535_v5 = vmul.f32 %v435_v36, %v351_v63 }
  0xf5   :  { %v471_v28 = vpack.c.bf16 %v1535_v5, %v1535_v5  ;;  %v473_v14 = vmul.f32 %v1535_v5, %v1535_v5 }
  0xf7   :  { %657 = vmatmul.bf16.vlgmr.msrb.gmra.mxu1 %v471_v28  ;;  %683 = vmatmul.bf16.vlgmr.msrb.gmra.mxu3 %v471_v28  ;;  %v475_v16 = vpack.c.bf16 %v473_v14, %v473_v14 }
  0xff   :  { %696 = vmatmul.bf16.vlgmr.msra.gmra.mxu0 %v474_v11  ;;  %722 = vmatmul.bf16.vlgmr.msra.gmra.mxu2 %v474_v11 }
 0x107   :  { %709 = vmatmul.bf16.vlgmr.msra.gmra.mxu1 %v475_v16  ;;  %735 = vmatmul.bf16.vlgmr.msra.gmra.mxu3 %v475_v16 }
 0x16c   :  { %v645_v17 = vpop.f32.mrf.mxu0 }
 0x172   :  { %v671_v20 = vpop.f32.mrf.mxu2 }
 0x174   :  { %v658_v22 = vpop.f32.mrf.mxu1  ;;  %v647_v45 = vpop.f32.mrf.mxu0 }
 0x175   :  { %v659_v27 = vadd.f32 %v658_v22, %v645_v17 }
 0x177   :  { %v740_v29 = vmul.f32 %v659_v27, %v659_v27  ;;  %v768_v43 = vsub.f32 %v1530_v41, %v659_v27 }
 0x17a   :  { %v684_v47 = vpop.f32.mrf.mxu3  ;;  %v673_v51 = vpop.f32.mrf.mxu2 }
 0x17b   :  { %v685_v2 = vadd.f32 %v684_v47, %v671_v20 }
 0x17c   :  { %v660_v23 = vpop.f32.mrf.mxu1  ;;  %v697_v24 = vpop.f32.mrf.mxu0 }
 0x17d   :  { %v741_v32 = vmul.f32 %v685_v2, %v685_v2  ;;  %v769_v50 = vsub.f32 %v1535_v5, %v685_v2 }
 0x182   :  { %v686_v53 = vpop.f32.mrf.mxu3  ;;  %v723_v57 = vpop.f32.mrf.mxu2 }
 0x184   :  { %v710_v59 = vpop.f32.mrf.mxu1  ;;  %v699_v31 = vpop.f32.mrf.mxu0 }
 0x185   :  { %v711_v0 = vadd.f32 %v710_v59, %v697_v24 }
 0x187   :  { %v742_v6 = vsub.f32 %v711_v0, %v740_v29 }
 0x189   :  { %v744_v8 = vmax.f32 %v742_v6, 0.0 }
 0x18a   :  { %v736_v13 = vpop.f32.mrf.mxu3  ;;  %v725_v21 = vpop.f32.mrf.mxu2 }
 0x18b   :  { %v746_v15 = vadd.f32 1e-12, %v744_v8  ;;  %v737_v19 = vadd.f32 %v736_v13, %v723_v57 }
 0x18c   :  { %v712_v35 = vpop.f32.mrf.mxu1 }
 0x18d   :  { %1143 = vrsqrt.f32 %v746_v15  ;;  %v743_v26 = vsub.f32 %v737_v19, %v741_v32  ;;  %vm754_vm9 = vweird.f32 %v746_v15 }
 0x18f   :  { %v745_v30 = vmax.f32 %v743_v26, 0.0 }
 0x191   :  { %v747_v34 = vadd.f32 1e-12, %v745_v30 }
 0x192   :  { %v738_v37 = vpop.f32.mrf.mxu3 }
 0x193   :  { %v1144_v44 = vpop.eup %1143  ;;  %1145 = vrsqrt.f32 %v747_v34  ;;  %vm764_vm12 = vweird.f32 %v747_v34 }
 0x194   :  { %v749_v38 = vmul.f32 %v1144_v44, %v746_v15  ;;  %vm755_vm8 = vweird.f32 %v1144_v44 }
 0x195   :  { %vm756_vm10 = vmor %vm754_vm9, %vm755_vm8 }
 0x196   :  { %v750_v49 = vmul.f32 %v1144_v44, %v749_v38 }
 0x198   :  { %v751_v10 = vmul.f32 0.5, %v750_v49 }
 0x199   :  { %v1146_v60 = vpop.eup %1145 }
 0x19a   :  { %v752_v61 = vsub.f32 1.5, %v751_v10  ;;  %v759_v7 = vmul.f32 %v1146_v60, %v747_v34  ;;  %vm765_vm11 = vweird.f32 %v1146_v60 }
 0x19b   :  { %vm766_vm13 = vmor %vm764_vm12, %vm765_vm11 }
 0x19c   :  { %v753_v42 = vmul.f32 %v1144_v44, %v752_v61  ;;  %v760_v12 = vmul.f32 %v1146_v60, %v759_v7 }
 0x19e   :  { %v757_v46 = vsel %vm756_vm10, %v1144_v44, %v753_v42  ;;  %v761_v52 = vmul.f32 0.5, %v760_v12 }
 0x19f   :  { %v770_v33 = vmul.f32 %v768_v43, %v757_v46 }
 0x1a0   :  { %v762_v55 = vsub.f32 1.5, %v761_v52 }
 0x1a1   :  { %v778_v48 = vmul.f32 %v774_v25, %v770_v33 }
 0x1a2   :  { %v763_v56 = vmul.f32 %v1146_v60, %v762_v55 }
 0x1a3   :  { %v786_v39 = vadd.f32 %v782_v54, %v778_v48 }
 0x1a4   :  { %v767_v62 = vsel %vm766_vm13, %v1146_v60, %v763_v56 }
 0x1a5   :  { %v771_v1 = vmul.f32 %v769_v50, %v767_v62  ;;  %788 = vst [vmem:[#allocation11] sm:$0xff] %v786_v39 }
 0x1a7   :  { %v779_v41 = vmul.f32 %v775_v58, %v771_v1 }
 0x1a9   :  { %v787_v4 = vadd.f32 %v783_v3, %v779_v41 }
 0x1ab   :  { %789 = vst [vmem:[#allocation11 + $0x8] sm:$0xff] %v787_v4 }
 0x1ac   :  { %800 = dma.vmem_to_hbm [thread:$0]  %s796_s21, 256, %s798_s24, [#allocation4]  }
 0x1ad   :  { %1297 = dma.done.wait [#allocation4], 256  }
 0x1ae   :  { %1298 = vsyncadd [#allocation4], 4294967040 }
 0x1af   :  { %805 = vsyncpa [#allocation3], 1 }
 0x1b0   :  { %806 = vsyncpa [#allocation6], 1 }
 0x1b1   :  { %807 = vsyncpa [#allocation9], 1 }
 0x1b2   :  { %808 = vsyncpa [#allocation4], 1 }

// kernel: tpu_custom_call.1
= control target key start
LH: loop header
LB: loop body
LE: loop exit
PB: predicated region body
PF: predicated region fallthrough
CT: control target
= control target key end

     0   :  { %11 = vsyncpa [#allocation3], 0  ;;  %s1551_s0 = inlined_call_operand.hbm [shape: f32[8,256], index: 0, kind: input, shape index: {}]   ;;  %s1552_s1 = inlined_call_operand.hbm [shape: bf16[256,256], index: 1, kind: input, shape index: {}]   ;;  %s1553_s2 = inlined_call_operand.hbm [shape: f32[1,256], index: 2, kind: input, shape index: {}]   ;;  %s1554_s3 = inlined_call_operand.vmem [shape: f32[1,256], index: 3, kind: input, shape index: {}]   ;;  %s1555_s4 = inlined_call_operand.hbm [shape: f32[1,256], index: 4, kind: input, shape index: {}]   ;;  %s1556_s5 = inlined_call_operand.hbm [shape: bf16[256,256], index: 5, kind: input, shape index: {}]   ;;  %s1557_s6 = inlined_call_operand.hbm [shape: f32[8,256], index: 6, kind: output, shape index: {}]  }
   0x1   :  { %12 = vsyncpa [#allocation6], 0 }
   0x2   :  { %13 = vsyncpa [#allocation9], 0  ;;  %s30_s23 = sshll.u32 %s1552_s1, 4  ;;  %s31_s23 = int_to_ptr.hbm [resolvable:$true] %s30_s23 }
   0x3   :  { %14 = vsyncpa [#allocation4], 0  ;;  %s1299_s24 = smov [#allocation5]   ;;  %s57_s28 = sshll.u32 %s1555_s4, 4  ;;  %s58_s28 = int_to_ptr.hbm [resolvable:$true] %s57_s28 }
   0x4   :  { %s32_s25 = sshll.u32 %s1299_s24, 4  ;;  %s1300_s29 = smov 128   ;;  %s33_s25 = int_to_ptr.vmem [resolvable:$true] %s32_s25 }
   0x5   :  { %s1301_s30 = smov 8   ;;  %s1302_s7 = smov [#allocation8]  }
   0x6   :  { %38 = dma.hbm_to_vmem [thread:$0]  %s31_s23, 4096, %s33_s25, [#allocation6], %s1300_s29, %s1300_s29, %s1301_s30  }
   0x7   :  { %s59_s8 = sshll.u32 %s1302_s7, 4  ;;  %s20_s11 = sshll.u32 %s1551_s0, 4  ;;  %s60_s8 = int_to_ptr.vmem [resolvable:$true] %s59_s8  ;;  %s21_s11 = int_to_ptr.hbm [resolvable:$true] %s20_s11 }
   0x8   :  { %62 = dma.hbm_to_vmem [thread:$0]  %s58_s28, 32, %s60_s8, [#allocation9]  }
   0x9   :  { %s44_s13 = sshll.u32 %s1553_s2, 4  ;;  %s1303_s14 = smov [#allocation2]   ;;  %s45_s13 = int_to_ptr.hbm [resolvable:$true] %s44_s13 }
   0xa   :  { %s22_s15 = sshll.u32 %s1303_s14, 4  ;;  %s1304_s4 = smov [#allocation7]   ;;  %s23_s15 = int_to_ptr.vmem [resolvable:$true] %s22_s15 }
   0xb   :  { %25 = dma.hbm_to_vmem [thread:$0]  %s21_s11, 256, %s23_s15, [#allocation3]  }
   0xc   :  { %s46_s16 = sshll.u32 %s1304_s4, 4  ;;  %s67_s19 = sshll.u32 %s1556_s5, 4  ;;  %s47_s16 = int_to_ptr.vmem [resolvable:$true] %s46_s16  ;;  %s68_s19 = int_to_ptr.hbm [resolvable:$true] %s67_s19 }
   0xd   :  { %49 = dma.hbm_to_vmem [thread:$0]  %s45_s13, 32, %s47_s16, [#allocation6]  }
   0xe   :  { %s1305_s0 = smov [#allocation10]  }
   0xf   :  { %s69_s20 = sshll.u32 %s1305_s0, 4  ;;  %s70_s20 = int_to_ptr.vmem [resolvable:$true] %s69_s20 }
  0x10   :  { %75 = dma.hbm_to_vmem [thread:$0]  %s68_s19, 4096, %s70_s20, [#allocation9], %s1300_s29, %s1300_s29, %s1301_s30  }
  0x11   :  { %1291 = dma.done.wait [#allocation3], 256  }
  0x12   :  { %1292 = vsyncadd [#allocation3], 4294967040 }
  0x13   :  { %1293 = dma.done.wait [#allocation6], 4128  }
  0x14   :  { %1294 = vsyncadd [#allocation6], 4294963168 }
  0x15   :  { %1295 = dma.done.wait [#allocation9], 4128  }
  0x16   :  { %1296 = vsyncadd [#allocation9], 4294963168  ;;  %v867_v0 = vld [vmem:[#allocation5 + $0x70] sm:$0xf]  ;;  %v1082_v1 = vld [vmem:[#allocation5 + $0x74] sm:$0xf0] }
  0x17   :  { %v931_v2 = vld [vmem:[#allocation5 + $0xf0] sm:$0xf]  ;;  %v868_v3 = vor.u32 %v1082_v1, %v867_v0  ;;  %v1098_v4 = vld [vmem:[#allocation5 + $0xf4] sm:$0xf0]  ;;  %v1081_v5 = vld [vmem:[#allocation5 + $0x74] sm:$0xf] }
  0x18   :  { %v869_v6 = vld [vmem:[#allocation5 + $0x78] sm:$0xf0]  ;;  %v932_v7 = vor.u32 %v1098_v4, %v931_v2  ;;  %v1097_v9 = vld [vmem:[#allocation5 + $0xf4] sm:$0xf]  ;;  %v859_v11 = vld [vmem:[#allocation5 + $0x60] sm:$0xf] }
  0x19   :  { %v872_v8 = vor.u32 %v1081_v5, %v869_v6  ;;  %v933_v10 = vld [vmem:[#allocation5 + $0xf8] sm:$0xf0]  ;;  %298 = vmatpush.bf16.msra.mxu0 %v868_v3  ;;  %v1080_v13 = vld [vmem:[#allocation5 + $0x64] sm:$0xf0]  ;;  %v923_v14 = vld [vmem:[#allocation5 + $0xe0] sm:$0xf] }
  0x1a   :  { %v936_v12 = vor.u32 %v1097_v9, %v933_v10  ;;  %v1096_v15 = vld [vmem:[#allocation5 + $0xe4] sm:$0xf0]  ;;  %311 = vmatpush.bf16.msra.mxu1 %v932_v7  ;;  %v860_v16 = vor.u32 %v1080_v13, %v859_v11  ;;  %v1079_v18 = vld [vmem:[#allocation5 + $0x64] sm:$0xf]  ;;  %v861_v19 = vld [vmem:[#allocation5 + $0x68] sm:$0xf0] }
  0x1b   :  { %324 = vmatpush.bf16.msra.mxu2 %v872_v8  ;;  %v924_v17 = vor.u32 %v1096_v15, %v923_v14  ;;  %v1095_v20 = vld [vmem:[#allocation5 + $0xe4] sm:$0xf]  ;;  %v864_v21 = vor.u32 %v1079_v18, %v861_v19  ;;  %v925_v22 = vld [vmem:[#allocation5 + $0xe8] sm:$0xf0]  ;;  %v851_v23 = vld [vmem:[#allocation5 + $0x50] sm:$0xf] }
  0x1c   :  { %337 = vmatpush.bf16.msra.mxu3 %v936_v12  ;;  %v1078_v24 = vld [vmem:[#allocation5 + $0x54] sm:$0xf0]  ;;  %v928_v25 = vor.u32 %v1095_v20, %v925_v22  ;;  %v915_v26 = vld [vmem:[#allocation5 + $0xd0] sm:$0xf]  ;;  %v1077_v28 = vld [vmem:[#allocation5 + $0x54] sm:$0xf] }
  0x1d   :  { %v1094_v27 = vld [vmem:[#allocation5 + $0xd4] sm:$0xf0]  ;;  %299 = vmatpush.bf16.msra.mxu0 %v860_v16  ;;  %v852_v29 = vor.u32 %v1078_v24, %v851_v23  ;;  %v853_v30 = vld [vmem:[#allocation5 + $0x58] sm:$0xf0]  ;;  %v1093_v31 = vld [vmem:[#allocation5 + $0xd4] sm:$0xf] }
  0x1e   :  { %v917_v32 = vld [vmem:[#allocation5 + $0xd8] sm:$0xf0]  ;;  %312 = vmatpush.bf16.msra.mxu1 %v924_v17  ;;  %v916_v33 = vor.u32 %v1094_v27, %v915_v26  ;;  %v856_v34 = vor.u32 %v1077_v28, %v853_v30  ;;  %v843_v35 = vld [vmem:[#allocation5 + $0x40] sm:$0xf]  ;;  %v1076_v36 = vld [vmem:[#allocation5 + $0x44] sm:$0xf0] }
  0x1f   :  { %325 = vmatpush.bf16.msra.mxu2 %v864_v21  ;;  %v907_v37 = vld [vmem:[#allocation5 + $0xc0] sm:$0xf]  ;;  %v920_v38 = vor.u32 %v1093_v31, %v917_v32  ;;  %v1092_v39 = vld [vmem:[#allocation5 + $0xc4] sm:$0xf0]  ;;  %v1075_v40 = vld [vmem:[#allocation5 + $0x44] sm:$0xf]  ;;  %v844_v44 = vor.u32 %v1076_v36, %v843_v35 }
  0x20   :  { %338 = vmatpush.bf16.msra.mxu3 %v928_v25  ;;  %v845_v41 = vld [vmem:[#allocation5 + $0x48] sm:$0xf0]  ;;  %v1091_v42 = vld [vmem:[#allocation5 + $0xc4] sm:$0xf]  ;;  %v908_v45 = vor.u32 %v1092_v39, %v907_v37  ;;  %v835_v47 = vld [vmem:[#allocation5 + $0x30] sm:$0xf] }
  0x21   :  { %v909_v43 = vld [vmem:[#allocation5 + $0xc8] sm:$0xf0]  ;;  %300 = vmatpush.bf16.msra.mxu0 %v852_v29  ;;  %v848_v46 = vor.u32 %v1075_v40, %v845_v41  ;;  %v1074_v48 = vld [vmem:[#allocation5 + $0x34] sm:$0xf0]  ;;  %v899_v49 = vld [vmem:[#allocation5 + $0xb0] sm:$0xf] }
  0x22   :  { %313 = vmatpush.bf16.msra.mxu1 %v916_v33  ;;  %v912_v50 = vor.u32 %v1091_v42, %v909_v43  ;;  %v1090_v51 = vld [vmem:[#allocation5 + $0xb4] sm:$0xf0]  ;;  %v1073_v52 = vld [vmem:[#allocation5 + $0x34] sm:$0xf]  ;;  %v837_v53 = vld [vmem:[#allocation5 + $0x38] sm:$0xf0]  ;;  %v836_v56 = vor.u32 %v1074_v48, %v835_v47 }
  0x23   :  { %326 = vmatpush.bf16.msra.mxu2 %v856_v34  ;;  %v1089_v54 = vld [vmem:[#allocation5 + $0xb4] sm:$0xf]  ;;  %v901_v55 = vld [vmem:[#allocation5 + $0xb8] sm:$0xf0]  ;;  %v900_v57 = vor.u32 %v1090_v51, %v899_v49  ;;  %v840_v58 = vor.u32 %v1073_v52, %v837_v53  ;;  %v827_v59 = vld [vmem:[#allocation5 + $0x20] sm:$0xf] }
  0x24   :  { %339 = vmatpush.bf16.msra.mxu3 %v920_v38  ;;  %v1072_v60 = vld [vmem:[#allocation5 + $0x24] sm:$0xf0]  ;;  %v891_v61 = vld [vmem:[#allocation5 + $0xa0] sm:$0xf]  ;;  %v904_v62 = vor.u32 %v1089_v54, %v901_v55  ;;  %v1071_v0 = vld [vmem:[#allocation5 + $0x24] sm:$0xf] }
  0x25   :  { %301 = vmatpush.bf16.msra.mxu0 %v844_v44  ;;  %v1088_v63 = vld [vmem:[#allocation5 + $0xa4] sm:$0xf0]  ;;  %v829_v1 = vld [vmem:[#allocation5 + $0x28] sm:$0xf0]  ;;  %v1087_v2 = vld [vmem:[#allocation5 + $0xa4] sm:$0xf]  ;;  %v828_v4 = vor.u32 %v1072_v60, %v827_v59 }
  0x26   :  { %314 = vmatpush.bf16.msra.mxu1 %v908_v45  ;;  %v893_v3 = vld [vmem:[#allocation5 + $0xa8] sm:$0xf0]  ;;  %v892_v5 = vor.u32 %v1088_v63, %v891_v61  ;;  %v832_v6 = vor.u32 %v1071_v0, %v829_v1  ;;  %v819_v7 = vld [vmem:[#allocation5 + $0x10] sm:$0xf]  ;;  %v1070_v8 = vld [vmem:[#allocation5 + $0x14] sm:$0xf0] }
  0x27   :  { %327 = vmatpush.bf16.msra.mxu2 %v848_v46  ;;  %v883_v9 = vld [vmem:[#allocation5 + $0x90] sm:$0xf]  ;;  %v896_v10 = vor.u32 %v1087_v2, %v893_v3  ;;  %v1086_v11 = vld [vmem:[#allocation5 + $0x94] sm:$0xf0]  ;;  %v1069_v12 = vld [vmem:[#allocation5 + $0x14] sm:$0xf]  ;;  %v820_v16 = vor.u32 %v1070_v8, %v819_v7 }
  0x28   :  { %340 = vmatpush.bf16.msra.mxu3 %v912_v50  ;;  %v821_v13 = vld [vmem:[#allocation5 + $0x18] sm:$0xf0]  ;;  %v1085_v14 = vld [vmem:[#allocation5 + $0x94] sm:$0xf]  ;;  %v884_v17 = vor.u32 %v1086_v11, %v883_v9  ;;  %v811_v19 = vld [vmem:[#allocation5] sm:$0xf] }
  0x29   :  { %302 = vmatpush.bf16.msra.mxu0 %v836_v56  ;;  %v885_v15 = vld [vmem:[#allocation5 + $0x98] sm:$0xf0]  ;;  %v824_v18 = vor.u32 %v1069_v12, %v821_v13  ;;  %v1068_v20 = vld [vmem:[#allocation5 + $0x4] sm:$0xf0]  ;;  %v875_v21 = vld [vmem:[#allocation5 + $0x80] sm:$0xf] }
  0x2a   :  { %315 = vmatpush.bf16.msra.mxu1 %v900_v57  ;;  %v888_v22 = vor.u32 %v1085_v14, %v885_v15  ;;  %v1084_v23 = vld [vmem:[#allocation5 + $0x84] sm:$0xf0]  ;;  %v1067_v24 = vld [vmem:[#allocation5 + $0x4] sm:$0xf]  ;;  %v813_v25 = vld [vmem:[#allocation5 + $0x8] sm:$0xf0]  ;;  %v812_v28 = vor.u32 %v1068_v20, %v811_v19 }
  0x2b   :  { %328 = vmatpush.bf16.msra.mxu2 %v840_v58  ;;  %v1083_v26 = vld [vmem:[#allocation5 + $0x84] sm:$0xf]  ;;  %v877_v27 = vld [vmem:[#allocation5 + $0x88] sm:$0xf0]  ;;  %v96_v29 = vld [vmem:[#allocation2] sm:$0xff]  ;;  %v876_v30 = vor.u32 %v1084_v23, %v875_v21  ;;  %v816_v31 = vor.u32 %v1067_v24, %v813_v25  ;;  %s797_s24 = sshll.u32 %s1557_s6, 4  ;;  %s798_s24 = int_to_ptr.hbm [resolvable:$true] %s797_s24 }
  0x2c   :  { %341 = vmatpush.bf16.msra.mxu3 %v904_v62  ;;  %v97_v32 = vld [vmem:[#allocation2 + $0x8] sm:$0xff]  ;;  %v880_v33 = vor.u32 %v1083_v26, %v877_v27  ;;  %v98_v34 = vpack.c.bf16 %v96_v29, %v96_v29  ;;  %v997_v36 = vld [vmem:[#allocation10 + $0x70] sm:$0xf]  ;;  %v999_v40 = vld [vmem:[#allocation10 + $0x78] sm:$0xf0] }
  0x2d   :  { %303 = vmatpush.bf16.msra.mxu0 %v828_v4  ;;  %v99_v35 = vpack.c.bf16 %v97_v32, %v97_v32  ;;  %v1114_v37 = vld [vmem:[#allocation10 + $0x74] sm:$0xf0]  ;;  %v1113_v38 = vld [vmem:[#allocation10 + $0x74] sm:$0xf]  ;;  %v989_v42 = vld [vmem:[#allocation10 + $0x60] sm:$0xf] }
  0x2e   :  { %316 = vmatpush.bf16.msra.mxu1 %v892_v5  ;;  %v1357_v39 = vor.u32 %v1114_v37, %v997_v36  ;;  %v1359_v41 = vor.u32 %v1113_v38, %v999_v40  ;;  %v1112_v43 = vld [vmem:[#allocation10 + $0x64] sm:$0xf0]  ;;  %v1111_v44 = vld [vmem:[#allocation10 + $0x64] sm:$0xf]  ;;  %v991_v46 = vld [vmem:[#allocation10 + $0x68] sm:$0xf0] }
  0x2f   :  { %329 = vmatpush.bf16.msra.mxu2 %v832_v6  ;;  %v1363_v45 = vor.u32 %v1112_v43, %v989_v42  ;;  %v1365_v47 = vor.u32 %v1111_v44, %v991_v46  ;;  %v1061_v48 = vld [vmem:[#allocation10 + $0xf0] sm:$0xf]  ;;  %v1130_v49 = vld [vmem:[#allocation10 + $0xf4] sm:$0xf0]  ;;  %v1129_v50 = vld [vmem:[#allocation10 + $0xf4] sm:$0xf] }
  0x30   :  { %342 = vmatpush.bf16.msra.mxu3 %v896_v10  ;;  %v1368_v51 = vor.u32 %v1130_v49, %v1061_v48  ;;  %v1063_v52 = vld [vmem:[#allocation10 + $0xf8] sm:$0xf0]  ;;  %v981_v54 = vld [vmem:[#allocation10 + $0x50] sm:$0xf]  ;;  %v1110_v55 = vld [vmem:[#allocation10 + $0x54] sm:$0xf0] }
  0x31   :  { %304 = vmatpush.bf16.msra.mxu0 %v820_v16  ;;  %v1371_v53 = vor.u32 %v1129_v50, %v1063_v52  ;;  %v1109_v56 = vld [vmem:[#allocation10 + $0x54] sm:$0xf]  ;;  %v1374_v57 = vor.u32 %v1110_v55, %v981_v54  ;;  %v983_v58 = vld [vmem:[#allocation10 + $0x58] sm:$0xf0]  ;;  %v1053_v60 = vld [vmem:[#allocation10 + $0xe0] sm:$0xf] }
  0x32   :  { %317 = vmatpush.bf16.msra.mxu1 %v884_v17  ;;  %v1377_v59 = vor.u32 %v1109_v56, %v983_v58  ;;  %v1128_v61 = vld [vmem:[#allocation10 + $0xe4] sm:$0xf0]  ;;  %v1127_v62 = vld [vmem:[#allocation10 + $0xe4] sm:$0xf]  ;;  %v1379_v63 = vld [vmem:[#allocation7] sm:$0x3] }
  0x33   :  { %330 = vmatpush.bf16.msra.mxu2 %v824_v18  ;;  %v1382_v0 = vor.u32 %v1128_v61, %v1053_v60  ;;  %v1055_v1 = vld [vmem:[#allocation10 + $0xe8] sm:$0xf0]  ;;  %v973_v3 = vld [vmem:[#allocation10 + $0x40] sm:$0xf]  ;;  %v1108_v4 = vld [vmem:[#allocation10 + $0x44] sm:$0xf0] }
  0x34   :  { %343 = vmatpush.bf16.msra.mxu3 %v888_v22  ;;  %v1385_v2 = vor.u32 %v1127_v62, %v1055_v1  ;;  %v1107_v5 = vld [vmem:[#allocation10 + $0x44] sm:$0xf]  ;;  %v1388_v6 = vor.u32 %v1108_v4, %v973_v3  ;;  %v975_v7 = vld [vmem:[#allocation10 + $0x48] sm:$0xf0]  ;;  %v1045_v9 = vld [vmem:[#allocation10 + $0xd0] sm:$0xf] }
  0x35   :  { %305 = vmatpush.bf16.msra.mxu0 %v812_v28  ;;  %v1391_v8 = vor.u32 %v1107_v5, %v975_v7  ;;  %v1126_v10 = vld [vmem:[#allocation10 + $0xd4] sm:$0xf0]  ;;  %v1125_v11 = vld [vmem:[#allocation10 + $0xd4] sm:$0xf]  ;;  %v134_v12 = vperm.slane %v1379_v63, 0  ;;  %v135_v43 = vperm.slane %v1379_v63, 1 }
  0x36   :  { %318 = vmatpush.bf16.msra.mxu1 %v876_v30  ;;  %v1395_v13 = vor.u32 %v1126_v10, %v1045_v9  ;;  %v1047_v14 = vld [vmem:[#allocation10 + $0xd8] sm:$0xf0]  ;;  %v965_v16 = vld [vmem:[#allocation10 + $0x30] sm:$0xf]  ;;  %v1106_v17 = vld [vmem:[#allocation10 + $0x34] sm:$0xf0] }
  0x37   :  { %331 = vmatpush.bf16.msra.mxu2 %v816_v31  ;;  %v1398_v15 = vor.u32 %v1125_v11, %v1047_v14  ;;  %v1105_v18 = vld [vmem:[#allocation10 + $0x34] sm:$0xf]  ;;  %v1401_v19 = vor.u32 %v1106_v17, %v965_v16  ;;  %v967_v20 = vld [vmem:[#allocation10 + $0x38] sm:$0xf0]  ;;  %v1037_v22 = vld [vmem:[#allocation10 + $0xc0] sm:$0xf] }
  0x38   :  { %344 = vmatpush.bf16.msra.mxu3 %v880_v33  ;;  %306 = vmatmul.bf16.vlgmr.msra.gmra.mxu0 %v98_v34  ;;  %v1404_v21 = vor.u32 %v1105_v18, %v967_v20  ;;  %v1124_v23 = vld [vmem:[#allocation10 + $0xc4] sm:$0xf0]  ;;  %v1123_v24 = vld [vmem:[#allocation10 + $0xc4] sm:$0xf]  ;;  %v1039_v27 = vld [vmem:[#allocation10 + $0xc8] sm:$0xf0] }
  0x39   :  { %319 = vmatmul.bf16.vlgmr.msra.gmra.mxu1 %v99_v35  ;;  %636 = vmatpush.bf16.msrb.mxu0 %v1357_v39  ;;  %v1407_v26 = vor.u32 %v1124_v23, %v1037_v22  ;;  %v1410_v30 = vor.u32 %v1123_v24, %v1039_v27  ;;  %v957_v31 = vld [vmem:[#allocation10 + $0x20] sm:$0xf]  ;;  %v1104_v32 = vld [vmem:[#allocation10 + $0x24] sm:$0xf0]  ;;  %v1103_v33 = vld [vmem:[#allocation10 + $0x24] sm:$0xf] }
  0x3a   :  { %332 = vmatmul.bf16.vlgmr.msra.gmra.mxu2 %v98_v34  ;;  %649 = vmatpush.bf16.msrb.mxu1 %v1368_v51  ;;  %v1413_v34 = vor.u32 %v1104_v32, %v957_v31  ;;  %v1029_v38 = vld [vmem:[#allocation10 + $0xb0] sm:$0xf]  ;;  %v1122_v40 = vld [vmem:[#allocation10 + $0xb4] sm:$0xf0]  ;;  %v1121_v42 = vld [vmem:[#allocation10 + $0xb4] sm:$0xf] }
  0x3b   :  { %345 = vmatmul.bf16.vlgmr.msra.gmra.mxu3 %v99_v35  ;;  %662 = vmatpush.bf16.msrb.mxu2 %v1359_v41  ;;  %v959_v35 = vld [vmem:[#allocation10 + $0x28] sm:$0xf0]  ;;  %v1422_v44 = vor.u32 %v1122_v40, %v1029_v38  ;;  %v1031_v46 = vld [vmem:[#allocation10 + $0xb8] sm:$0xf0]  ;;  %v949_v50 = vld [vmem:[#allocation10 + $0x10] sm:$0xf] }
  0x3c   :  { %675 = vmatpush.bf16.msrb.mxu3 %v1371_v53  ;;  %v1418_v37 = vor.u32 %v1103_v33, %v959_v35  ;;  %v1428_v49 = vor.u32 %v1121_v42, %v1031_v46  ;;  %v1102_v52 = vld [vmem:[#allocation10 + $0x14] sm:$0xf0]  ;;  %v1101_v54 = vld [vmem:[#allocation10 + $0x14] sm:$0xf]  ;;  %v951_v55 = vld [vmem:[#allocation10 + $0x18] sm:$0xf0] }
  0x3d   :  { %637 = vmatpush.bf16.msrb.mxu0 %v1363_v45  ;;  %v1434_v60 = vor.u32 %v1102_v52, %v949_v50  ;;  %v1436_v61 = vor.u32 %v1101_v54, %v951_v55  ;;  %v1021_v62 = vld [vmem:[#allocation10 + $0xa0] sm:$0xf]  ;;  %v1120_v63 = vld [vmem:[#allocation10 + $0xa4] sm:$0xf0]  ;;  %v1119_v1 = vld [vmem:[#allocation10 + $0xa4] sm:$0xf] }
  0x3e   :  { %650 = vmatpush.bf16.msrb.mxu1 %v1382_v0  ;;  %v1438_v7 = vor.u32 %v1120_v63, %v1021_v62  ;;  %v1023_v9 = vld [vmem:[#allocation10 + $0xa8] sm:$0xf0]  ;;  %v941_v14 = vld [vmem:[#allocation10] sm:$0xf]  ;;  %v1100_v16 = vld [vmem:[#allocation10 + $0x4] sm:$0xf0] }
  0x3f   :  { %663 = vmatpush.bf16.msrb.mxu2 %v1365_v47  ;;  %v1449_v18 = vor.u32 %v1100_v16, %v941_v14  ;;  %v1099_v20 = vld [vmem:[#allocation10 + $0x4] sm:$0xf]  ;;  %v943_v22 = vld [vmem:[#allocation10 + $0x8] sm:$0xf0]  ;;  %v1013_v27 = vld [vmem:[#allocation10 + $0x90] sm:$0xf] }
  0x40   :  { %676 = vmatpush.bf16.msrb.mxu3 %v1385_v2  ;;  %v1117_v35 = vld [vmem:[#allocation10 + $0x94] sm:$0xf]  ;;  %v1015_v40 = vld [vmem:[#allocation10 + $0x98] sm:$0xf0]  ;;  %v1005_v52 = vld [vmem:[#allocation10 + $0x80] sm:$0xf] }
  0x41   :  { %638 = vmatpush.bf16.msrb.mxu0 %v1374_v57  ;;  %v1470_v50 = vor.u32 %v1117_v35, %v1015_v40  ;;  %v1116_v54 = vld [vmem:[#allocation10 + $0x84] sm:$0xf0]  ;;  %v1115_v55 = vld [vmem:[#allocation10 + $0x84] sm:$0xf] }
  0x42   :  { %651 = vmatpush.bf16.msrb.mxu1 %v1395_v13  ;;  %v1474_v62 = vor.u32 %v1116_v54, %v1005_v52 }
  0x43   :  { %664 = vmatpush.bf16.msrb.mxu2 %v1377_v59 }
  0x44   :  { %677 = vmatpush.bf16.msrb.mxu3 %v1398_v15 }
  0x45   :  { %639 = vmatpush.bf16.msrb.mxu0 %v1388_v6 }
  0x46   :  { %652 = vmatpush.bf16.msrb.mxu1 %v1407_v26 }
  0x47   :  { %665 = vmatpush.bf16.msrb.mxu2 %v1391_v8 }
  0x48   :  { %678 = vmatpush.bf16.msrb.mxu3 %v1410_v30 }
  0x49   :  { %640 = vmatpush.bf16.msrb.mxu0 %v1401_v19 }
  0x4a   :  { %653 = vmatpush.bf16.msrb.mxu1 %v1422_v44 }
  0x4b   :  { %666 = vmatpush.bf16.msrb.mxu2 %v1404_v21 }
  0x4c   :  { %679 = vmatpush.bf16.msrb.mxu3 %v1428_v49 }
  0x4d   :  { %641 = vmatpush.bf16.msrb.mxu0 %v1413_v34 }
  0x4e   :  { %654 = vmatpush.bf16.msrb.mxu1 %v1438_v7 }
  0x4f   :  { %667 = vmatpush.bf16.msrb.mxu2 %v1418_v37 }
  0x51   :  { %642 = vmatpush.bf16.msrb.mxu0 %v1434_v60 }
  0x53   :  { %668 = vmatpush.bf16.msrb.mxu2 %v1436_v61 }
  0x55   :  { %643 = vmatpush.bf16.msrb.mxu0 %v1449_v18 }
  0x59   :  { %688 = vmatpush.bf16.msra.mxu0 %v1357_v39  ;;  %v1007_v39 = vld [vmem:[#allocation10 + $0x88] sm:$0xf0] }
  0x5a   :  { %v1477_v63 = vor.u32 %v1115_v55, %v1007_v39 }
  0x5d   :  { %689 = vmatpush.bf16.msra.mxu0 %v1363_v45 }
  0x61   :  { %690 = vmatpush.bf16.msra.mxu0 %v1374_v57 }
  0x65   :  { %691 = vmatpush.bf16.msra.mxu0 %v1388_v6 }
  0x69   :  { %692 = vmatpush.bf16.msra.mxu0 %v1401_v19 }
  0x6d   :  { %693 = vmatpush.bf16.msra.mxu0 %v1413_v34 }
  0x71   :  { %694 = vmatpush.bf16.msra.mxu0 %v1434_v60 }
  0x75   :  { %695 = vmatpush.bf16.msra.mxu0 %v1449_v18 }
  0xb5   :  { %v307_v25 = vpop.f32.mrf.mxu0 }
  0xb6   :  { %v308_v28 = vadd.f32 %v307_v25, %v134_v12  ;;  %v320_v29 = vpop.f32.mrf.mxu1  ;;  %v1444_v12 = vor.u32 %v1119_v1, %v1023_v9  ;;  %v1454_v25 = vor.u32 %v1099_v20, %v943_v22 }
  0xb8   :  { %v1415_v36 = vadd.f32 %v320_v29, %v308_v28  ;;  %680 = vmatpush.bf16.msrb.mxu3 %v1444_v12  ;;  %v1118_v29 = vld [vmem:[#allocation10 + $0x94] sm:$0xf0]  ;;  %669 = vmatpush.bf16.msrb.mxu2 %v1454_v25 }
  0xb9   :  { %v1461_v33 = vor.u32 %v1118_v29, %v1013_v27 }
  0xba   :  { %v1425_v48 = vmul.f32 0.70710677, %v1415_v36 }
  0xbb   :  { %655 = vmatpush.bf16.msrb.mxu1 %v1461_v33 }
  0xbc   :  { %v354_v56 = vmul.f32 %v1425_v48, %v1425_v48  ;;  %714 = vmatpush.bf16.msra.mxu2 %v1359_v41  ;;  %681 = vmatpush.bf16.msrb.mxu3 %v1470_v50 }
  0xbd   :  { %v333_v58 = vpop.f32.mrf.mxu2  ;;  %v309_v5 = vpop.f32.mrf.mxu0 }
  0xbe   :  { %v334_v3 = vadd.f32 %v333_v58, %v135_v43  ;;  %v346_v4 = vpop.f32.mrf.mxu3  ;;  %v1440_v10 = vmin.f32 %v354_v56, 16.0  ;;  %v322_v11 = vpop.f32.mrf.mxu1 }
  0xbf   :  { %656 = vmatpush.bf16.msrb.mxu1 %v1474_v62 }
  0xc0   :  { %v1446_v17 = vadd.f32 %v346_v4, %v334_v3  ;;  %v356_v23 = vmul.f32 2.1237322e-06, %v1440_v10  ;;  %v367_v24 = vmul.f32 3.8918573e-05, %v1440_v10  ;;  %715 = vmatpush.bf16.msra.mxu2 %v1365_v47  ;;  %682 = vmatpush.bf16.msrb.mxu3 %v1477_v63 }
  0xc2   :  { %v1457_v28 = vmul.f32 0.70710677, %v1446_v17  ;;  %v357_v31 = vadd.f32 0.00028619796, %v356_v23  ;;  %v368_v32 = vadd.f32 0.001143296, %v367_v24 }
  0xc3   :  { %701 = vmatpush.bf16.msra.mxu1 %v1368_v51 }
  0xc4   :  { %v394_v38 = vmul.f32 %v1457_v28, %v1457_v28  ;;  %v358_v42 = vmul.f32 %v357_v31, %v1440_v10  ;;  %v369_v43 = vmul.f32 %v368_v32, %v1440_v10  ;;  %727 = vmatpush.bf16.msra.mxu3 %v1371_v53  ;;  %716 = vmatpush.bf16.msra.mxu2 %v1377_v59 }
  0xc5   :  { %v335_v46 = vpop.f32.mrf.mxu2 }
  0xc6   :  { %v1472_v56 = vmin.f32 %v394_v38, 16.0  ;;  %v348_v58 = vpop.f32.mrf.mxu3  ;;  %v370_v41 = vadd.f32 0.014752088, %v369_v43  ;;  %v359_v1 = vadd.f32 0.0036580483, %v358_v42 }
  0xc7   :  { %702 = vmatpush.bf16.msra.mxu1 %v1382_v0 }
  0xc8   :  { %v396_v3 = vmul.f32 2.1237322e-06, %v1472_v56  ;;  %v407_v4 = vmul.f32 3.8918573e-05, %v1472_v56  ;;  %v371_v5 = vmul.f32 %v370_v41, %v1440_v10  ;;  %v360_v16 = vmul.f32 %v359_v1, %v1440_v10  ;;  %728 = vmatpush.bf16.msra.mxu3 %v1385_v2  ;;  %717 = vmatpush.bf16.msra.mxu2 %v1391_v8 }
  0xca   :  { %v397_v9 = vadd.f32 0.00028619796, %v396_v3  ;;  %v408_v11 = vadd.f32 0.001143296, %v407_v4  ;;  %v372_v14 = vadd.f32 0.112945676, %v371_v5 }
  0xcb   :  { %v361_v24 = vadd.f32 0.05243302, %v360_v16  ;;  %703 = vmatpush.bf16.msra.mxu1 %v1395_v13 }
  0xcc   :  { %v398_v20 = vmul.f32 %v397_v9, %v1472_v56  ;;  %v409_v22 = vmul.f32 %v408_v11, %v1472_v56  ;;  %v373_v45 = vmul.f32 %v372_v14, %v1440_v10  ;;  %729 = vmatpush.bf16.msra.mxu3 %v1398_v15  ;;  %718 = vmatpush.bf16.msra.mxu2 %v1404_v21 }
  0xcd   :  { %v362_v0 = vmul.f32 %v361_v24, %v1440_v10 }
  0xce   :  { %v410_v47 = vadd.f32 0.014752088, %v409_v22  ;;  %v374_v51 = vadd.f32 0.4994258, %v373_v45  ;;  %v399_v23 = vadd.f32 0.0036580483, %v398_v20 }
  0xcf   :  { %704 = vmatpush.bf16.msra.mxu1 %v1407_v26  ;;  %v363_v8 = vadd.f32 0.18741608, %v362_v0 }
  0xd0   :  { %v411_v27 = vmul.f32 %v410_v47, %v1472_v56  ;;  %v375_v53 = vmul.f32 %v374_v51, %v1440_v10  ;;  %v400_v29 = vmul.f32 %v399_v23, %v1472_v56  ;;  %730 = vmatpush.bf16.msra.mxu3 %v1410_v30  ;;  %719 = vmatpush.bf16.msra.mxu2 %v1418_v37 }
  0xd1   :  { %v364_v21 = vmul.f32 %v363_v8, %v1440_v10 }
  0xd2   :  { %v412_v57 = vadd.f32 0.112945676, %v411_v27  ;;  %v376_v59 = vadd.f32 1.0, %v375_v53  ;;  %v401_v6 = vadd.f32 0.05243302, %v400_v29 }
  0xd3   :  { %705 = vmatpush.bf16.msra.mxu1 %v1422_v44  ;;  %v365_v37 = vadd.f32 1.1283791, %v364_v21 }
  0xd4   :  { %v413_v31 = vmul.f32 %v412_v57, %v1472_v56  ;;  %1139 = vrcp.f32 %v376_v59  ;;  %v402_v19 = vmul.f32 %v401_v6, %v1472_v56  ;;  %731 = vmatpush.bf16.msra.mxu3 %v1428_v49  ;;  %720 = vmatpush.bf16.msra.mxu2 %v1436_v61  ;;  %v388_v30 = vand.u32 2147483648, %v376_v59 }
  0xd5   :  { %v386_v38 = vand.u32 2147483647, %v376_v59  ;;  %vm382_vm1 = vweird.f32 %v376_v59  ;;  %v366_v40 = vmul.f32 %v365_v37, %v1425_v48  ;;  %v350_v48 = vmul.f32 0.5, %v1415_v36 }
  0xd6   :  { %v414_v2 = vadd.f32 0.4994258, %v413_v31  ;;  %v403_v34 = vadd.f32 0.18741608, %v402_v19  ;;  %v389_v60 = vor.u32 1.1754944e-38, %v388_v30 }
  0xd7   :  { %706 = vmatpush.bf16.msra.mxu1 %v1438_v7  ;;  %vm387_vm3 = vcmp.eq.f32.partialorder %v386_v38, 8.507059e+37 }
  0xd8   :  { %v415_v13 = vmul.f32 %v414_v2, %v1472_v56  ;;  %732 = vmatpush.bf16.msra.mxu3 %v1444_v12  ;;  %721 = vmatpush.bf16.msra.mxu2 %v1454_v25  ;;  %v404_v61 = vmul.f32 %v403_v34, %v1472_v56 }
  0xda   :  { %v416_v32 = vadd.f32 1.0, %v415_v13  ;;  %v1140_v15 = vpop.eup %1139  ;;  %v405_v46 = vadd.f32 1.1283791, %v404_v61 }
  0xdb   :  { %v378_v35 = vmul.f32 %v1140_v15, %v376_v59  ;;  %vm383_vm0 = vweird.f32 %v1140_v15  ;;  %707 = vmatpush.bf16.msra.mxu1 %v1461_v33 }
  0xdc   :  { %1141 = vrcp.f32 %v416_v32  ;;  %vm384_vm2 = vmor %vm382_vm1, %vm383_vm0  ;;  %733 = vmatpush.bf16.msra.mxu3 %v1470_v50  ;;  %v428_v25 = vand.u32 2147483648, %v416_v32  ;;  %v426_v33 = vand.u32 2147483647, %v416_v32  ;;  %vm422_vm5 = vweird.f32 %v416_v32 }
  0xdd   :  { %v379_v26 = vsub.f32 1.0, %v378_v35  ;;  %v406_v58 = vmul.f32 %v405_v46, %v1457_v28 }
  0xde   :  { %v429_v50 = vor.u32 1.1754944e-38, %v428_v25  ;;  %vm427_vm7 = vcmp.eq.f32.partialorder %v426_v33, 8.507059e+37 }
  0xdf   :  { %v380_v44 = vmul.f32 %v1140_v15, %v379_v26  ;;  %708 = vmatpush.bf16.msra.mxu1 %v1474_v62 }
  0xe0   :  { %734 = vmatpush.bf16.msra.mxu3 %v1477_v63  ;;  %v351_v63 = vmul.f32 0.5, %v1446_v17 }
  0xe1   :  { %v381_v10 = vadd.f32 %v1140_v15, %v380_v44 }
  0xe2   :  { %v1142_v49 = vpop.eup %1141 }
  0xe3   :  { %v418_v7 = vmul.f32 %v1142_v49, %v416_v32  ;;  %v385_v42 = vsel %vm384_vm2, %v1140_v15, %v381_v10  ;;  %vm423_vm4 = vweird.f32 %v1142_v49 }
  0xe4   :  { %v390_v12 = vsel %vm387_vm3, %v389_v60, %v385_v42  ;;  %vm424_vm6 = vmor %vm422_vm5, %vm423_vm4 }
  0xe5   :  { %v419_v18 = vsub.f32 1.0, %v418_v7  ;;  %v391_v43 = vmul.f32 %v390_v12, %v366_v40  ;;  %v772_v40 = vld [vmem:[%s1554_s3] sm:$0x3]  ;;  %s1306_s3 = smov [#allocation11]  }
  0xe6   :  { %v774_v25 = vperm.slane %v772_v40, 0  ;;  %s795_s21 = sshll.u32 %s1306_s3, 4  ;;  %s796_s21 = int_to_ptr.vmem [resolvable:$true] %s795_s21 }
  0xe7   :  { %v420_v52 = vmul.f32 %v1142_v49, %v419_v18  ;;  %v937_v54 = vclamps-f32 %v391_v43, 1.0  ;;  %v780_v18 = vld [vmem:[#allocation8] sm:$0x3] }
  0xe9   :  { %v421_v55 = vadd.f32 %v1142_v49, %v420_v52  ;;  %v434_v56 = vadd.f32 1.0, %v937_v54  ;;  %v782_v54 = vperm.slane %v780_v18, 0 }
  0xeb   :  { %v425_v39 = vsel %vm424_vm6, %v1142_v49, %v421_v55  ;;  %v1530_v41 = vmul.f32 %v434_v56, %v350_v48 }
  0xec   :  { %v430_v62 = vsel %vm427_vm7, %v429_v50, %v425_v39 }
  0xed   :  { %v431_v1 = vmul.f32 %v430_v62, %v406_v58  ;;  %v470_v3 = vpack.c.bf16 %v1530_v41, %v1530_v41  ;;  %v472_v9 = vmul.f32 %v1530_v41, %v1530_v41  ;;  %v775_v58 = vperm.slane %v772_v40, 1 }
  0xef   :  { %v938_v4 = vclamps-f32 %v431_v1, 1.0  ;;  %644 = vmatmul.bf16.vlgmr.msrb.gmra.mxu0 %v470_v3  ;;  %670 = vmatmul.bf16.vlgmr.msrb.gmra.mxu2 %v470_v3  ;;  %v474_v11 = vpack.c.bf16 %v472_v9, %v472_v9  ;;  %v783_v3 = vperm.slane %v780_v18, 1 }
  0xf1   :  { %v435_v36 = vadd.f32 1.0, %v938_v4 }
  0xf3   :  { %v1535_v5 = vmul.f32 %v435_v36, %v351_v63 }
  0xf5   :  { %v471_v28 = vpack.c.bf16 %v1535_v5, %v1535_v5  ;;  %v473_v14 = vmul.f32 %v1535_v5, %v1535_v5 }
  0xf7   :  { %657 = vmatmul.bf16.vlgmr.msrb.gmra.mxu1 %v471_v28  ;;  %683 = vmatmul.bf16.vlgmr.msrb.gmra.mxu3 %v471_v28  ;;  %v475_v16 = vpack.c.bf16 %v473_v14, %v473_v14 }
  0xff   :  { %696 = vmatmul.bf16.vlgmr.msra.gmra.mxu0 %v474_v11  ;;  %722 = vmatmul.bf16.vlgmr.msra.gmra.mxu2 %v474_v11 }
 0x107   :  { %709 = vmatmul.bf16.vlgmr.msra.gmra.mxu1 %v475_v16  ;;  %735 = vmatmul.bf16.vlgmr.msra.gmra.mxu3 %v475_v16 }
 0x16c   :  { %v645_v17 = vpop.f32.mrf.mxu0 }
 0x172   :  { %v671_v20 = vpop.f32.mrf.mxu2 }
 0x174   :  { %v658_v22 = vpop.f32.mrf.mxu1  ;;  %v647_v45 = vpop.f32.mrf.mxu0 }
 0x175   :  { %v659_v27 = vadd.f32 %v658_v22, %v645_v17 }
 0x177   :  { %v740_v29 = vmul.f32 %v659_v27, %v659_v27  ;;  %v768_v43 = vsub.f32 %v1530_v41, %v659_v27 }
 0x17a   :  { %v684_v47 = vpop.f32.mrf.mxu3  ;;  %v673_v51 = vpop.f32.mrf.mxu2 }
 0x17b   :  { %v685_v2 = vadd.f32 %v684_v47, %v671_v20 }
 0x17c   :  { %v660_v23 = vpop.f32.mrf.mxu1  ;;  %v697_v24 = vpop.f32.mrf.mxu0 }
 0x17d   :  { %v741_v32 = vmul.f32 %v685_v2, %v685_v2  ;;  %v769_v50 = vsub.f32 %v1535_v5, %v685_v2 }
 0x182   :  { %v686_v53 = vpop.f32.mrf.mxu3  ;;  %v723_v57 = vpop.f32.mrf.mxu2 }
 0x184   :  { %v710_v59 = vpop.f32.mrf.mxu1  ;;  %v699_v31 = vpop.f32.mrf.mxu0 }
 0x185   :  { %v711_v0 = vadd.f32 %v710_v59, %v697_v24 }
 0x187   :  { %v742_v6 = vsub.f32 %v711_v0, %v740_v29 }
 0x189   :  { %v744_v8 = vmax.f32 %v742_v6, 0.0 }
 0x18a   :  { %v736_v13 = vpop.f32.mrf.mxu3  ;;  %v725_v21 = vpop.f32.mrf.mxu2 }
 0x18b   :  { %v746_v15 = vadd.f32 1e-12, %v744_v8  ;;  %v737_v19 = vadd.f32 %v736_v13, %v723_v57 }
 0x18c   :  { %v712_v35 = vpop.f32.mrf.mxu1 }
 0x18d   :  { %1143 = vrsqrt.f32 %v746_v15  ;;  %v743_v26 = vsub.f32 %v737_v19, %v741_v32  ;;  %vm754_vm9 = vweird.f32 %v746_v15 }
 0x18f   :  { %v745_v30 = vmax.f32 %v743_v26, 0.0 }
 0x191   :  { %v747_v34 = vadd.f32 1e-12, %v745_v30 }
 0x192   :  { %v738_v37 = vpop.f32.mrf.mxu3 }
 0x193   :  { %v1144_v44 = vpop.eup %1143  ;;  %1145 = vrsqrt.f32 %v747_v34  ;;  %vm764_vm12 = vweird.f32 %v747_v34 }
 0x194   :  { %v749_v38 = vmul.f32 %v1144_v44, %v746_v15  ;;  %vm755_vm8 = vweird.f32 %v1144_v44 }
 0x195   :  { %vm756_vm10 = vmor %vm754_vm9, %vm755_vm8 }
 0x196   :  { %v750_v49 = vmul.f32 %v1144_v44, %v749_v38 }
 0x198   :  { %v751_v10 = vmul.f32 0.5, %v750_v49 }
 0x199   :  { %v1146_v60 = vpop.eup %1145 }
 0x19a   :  { %v752_v61 = vsub.f32 1.5, %v751_v10  ;;  %v759_v7 = vmul.f32 %v1146_v60, %v747_v34  ;;  %vm765_vm11 = vweird.f32 %v1146_v60 }
 0x19b   :  { %vm766_vm13 = vmor %vm764_vm12, %vm765_vm11 }
 0x19c   :  { %v753_v42 = vmul.f32 %v1144_v44, %v752_v61  ;;  %v760_v12 = vmul.f32 %v1146_v60, %v759_v7 }
 0x19e   :  { %v757_v46 = vsel %vm756_vm10, %v1144_v44, %v753_v42  ;;  %v761_v52 = vmul.f32 0.5, %v760_v12 }
 0x19f   :  { %v770_v33 = vmul.f32 %v768_v43, %v757_v46 }
 0x1a0   :  { %v762_v55 = vsub.f32 1.5, %v761_v52 }
 0x1a1   :  { %v778_v48 = vmul.f32 %v774_v25, %v770_v33 }
 0x1a2   :  { %v763_v56 = vmul.f32 %v1146_v60, %v762_v55 }
 0x1a3   :  { %v786_v39 = vadd.f32 %v782_v54, %v778_v48 }
 0x1a4   :  { %v767_v62 = vsel %vm766_vm13, %v1146_v60, %v763_v56 }
 0x1a5   :  { %v771_v1 = vmul.f32 %v769_v50, %v767_v62  ;;  %788 = vst [vmem:[#allocation11] sm:$0xff] %v786_v39 }
 0x1a7   :  { %v779_v41 = vmul.f32 %v775_v58, %v771_v1 }
 0x1a9   :  { %v787_v4 = vadd.f32 %v783_v3, %v779_v41 }
 0x1ab   :  { %789 = vst [vmem:[#allocation11 + $0x8] sm:$0xff] %v787_v4 }
 0x1ac   :  { %800 = dma.vmem_to_hbm [thread:$0]  %s796_s21, 256, %s798_s24, [#allocation4]  }
 0x1ad   :  { %1297 = dma.done.wait [#allocation4], 256  }
 0x1ae   :  { %1298 = vsyncadd [#allocation4], 4294967040 }
 0x1af   :  { %805 = vsyncpa [#allocation3], 1 }
 0x1b0   :  { %806 = vsyncpa [#allocation6], 1 }
 0x1b1   :  { %807 = vsyncpa [#allocation9], 1 }
 0x1b2   :  { %808 = vsyncpa [#allocation4], 1 }

</bundles_post_ra>
